<compile_context>
chip_gen: v6e
topology: v6e:2x2x1
jax: 0.10.0
libtpu: 0.0.40
codegen_flags: <defaults>
</compile_context>

<pallas_src>
import functools
import math

import jax
import jax.numpy as jnp
from jax.experimental import pallas as pl
from jax.experimental.pallas import tpu as pltpu

MATMUL_DTYPE = jnp.bfloat16   # MXU operand dtype (accumulation stays f32)
LN_EPS = 1e-5

_PARAM_ORDER = ("wqkv", "bqkv", "wo", "small", "wf1", "bf1", "wf2")
# "small" rows: 0=bo, 1=ln1_gamma, 2=ln1_beta, 3=bf2, 4=ln2_gamma, 5=ln2_beta
_N_SMALL = 6


def _layer_norm(h, gamma, beta):
    mu = jnp.mean(h, axis=-1, keepdims=True)
    c = h - mu
    var = jnp.mean(c * c, axis=-1, keepdims=True)
    return c * (jax.lax.rsqrt(var + LN_EPS) * gamma) + beta


def encoder_stack_kernel(
    x_ref, wqkv_ref, bqkv_ref, wo_ref, small_ref, wf1_ref, bf1_ref, wf2_ref,
    o_ref,
    qkv_scr, ctx_scr,
    *, n_heads, d_keys, d_values):
    layer = pl.program_id(1)

    # First layer for this batch tile: seed the output block, which is the
    # VMEM-resident activation carry across the (arbitrary) layer axis.
    @pl.when(layer == 0)
    def _():
        o_ref[...] = x_ref[...]

    TB, S, D = o_ref.shape
    H, dk, dv = n_heads, d_keys, d_values
    M = TB * S

    x = o_ref[...].astype(jnp.float32).reshape(M, D)      # residual stream, f32
    xb = x.astype(MATMUL_DTYPE)

    # ---- Fused QKV projection (one lane-dense matmul) ----------------------
    # Column layout: [ Wq (H*dk, pre-scaled by 1/sqrt(dk)) | Wk (H*dk) | Wv (H*dv) ]
    qkv = jnp.dot(xb, wqkv_ref[0], preferred_element_type=jnp.float32)
    qkv_scr[...] = qkv + bqkv_ref[0]

    q_off, k_off, v_off = 0, H * dk, 2 * H * dk

    # ---- Per-head attention, batched over the batch tile -------------------
    # Head outputs are written lane-contiguously so ctx @ Wo is a single matmul.
    for h in range(H):
        qh = qkv_scr[:, q_off + h * dk: q_off + (h + 1) * dk]
        kh = qkv_scr[:, k_off + h * dk: k_off + (h + 1) * dk]
        vh = qkv_scr[:, v_off + h * dv: v_off + (h + 1) * dv]
        qh = qh.reshape(TB, S, dk).astype(MATMUL_DTYPE)
        kh = kh.reshape(TB, S, dk).astype(MATMUL_DTYPE)
        vh = vh.reshape(TB, S, dv).astype(MATMUL_DTYPE)

        # scale already folded into Wq/bq at init.
        s = jnp.einsum("bqd,bkd->bqk", qh, kh,
                       preferred_element_type=jnp.float32)       # (TB, S, S)
        s = s - jnp.max(s, axis=-1, keepdims=True)
        p = jnp.exp(s)
        p = p * pl.reciprocal(jnp.sum(p, axis=-1, keepdims=True), approx=True)

        ctx = jnp.einsum("bqk,bkd->bqd", p.astype(MATMUL_DTYPE), vh,
                         preferred_element_type=jnp.float32)     # (TB, S, dv)
        ctx_scr[:, h * dv:(h + 1) * dv] = ctx.reshape(M, dv)

    small = small_ref[0]                                         # (6, D) f32
    bo, g1, be1 = small[0:1], small[1:2], small[2:3]
    bf2, g2, be2 = small[3:4], small[4:5], small[5:6]

    # Output projection: concat(heads) @ Wo as one MXU contraction.
    attn = jnp.dot(ctx_scr[...].astype(MATMUL_DTYPE), wo_ref[0],
                   preferred_element_type=jnp.float32) + bo      # (M, D)

    # ---- Residual + LayerNorm 1 (dropout == identity at inference) ---------
    h1 = _layer_norm(x + attn, g1, be1)

    # ---- Feed-forward -------------------------------------------------------
    f = jnp.dot(h1.astype(MATMUL_DTYPE), wf1_ref[0],
                preferred_element_type=jnp.float32) + bf1_ref[0]
    f = jnp.maximum(f, 0.0)
    f = jnp.dot(f.astype(MATMUL_DTYPE), wf2_ref[0],
                preferred_element_type=jnp.float32) + bf2

    # ---- Residual + LayerNorm 2 ---------------------------------------------
    out = _layer_norm(h1 + f, g2, be2)

    # Carry (and, after the last layer, the HBM writeback) lives in o_ref.
    o_ref[...] = out.reshape(TB, S, D).astype(o_ref.dtype)


def transformer_encoder_pallas(x, stacked, *, n_heads, d_keys, d_values,
                               batch_tile=None):
    """Run the full encoder stack in one fused pallas_call.

    x: (B, S, D).  stacked: dict of per-layer-stacked arrays (leading axis =
    n_blocks) in the _PARAM_ORDER layout produced by init_stacked_params."""
    B, S, D = x.shape
    n_blocks = stacked["wqkv"].shape[0]
    qkv_w = stacked["wqkv"].shape[-1]
    h_dv = n_heads * d_values

    # One batch tile by default (weights streamed once total). On v7x pick
    # batch_tile <= B//2 so the "parallel" axis feeds both TensorCores.
    TB = B if batch_tile is None else batch_tile
    assert B % TB == 0, (B, TB)

    weights = [stacked[k] for k in _PARAM_ORDER]

    def wspec(arr):
        n_trailing = arr.ndim - 1
        return pl.BlockSpec((1,) + tuple(arr.shape[1:]),
                            lambda b, l, _n=n_trailing: (l,) + (0,) * _n)

    kernel = functools.partial(encoder_stack_kernel, n_heads=n_heads,
                               d_keys=d_keys, d_values=d_values)

    # Explicit VMEM budget: double-buffered per-layer weights + activation
    # blocks + scratches, with headroom; clamped below v7x physical (64 MiB).
    per_layer_bytes = sum(math.prod(w.shape[1:]) * w.dtype.itemsize
                          for w in weights)
    act_bytes = TB * S * (3 * D + qkv_w + h_dv + n_heads * S) * 4
    vmem_limit = int(min(max(3 * per_layer_bytes + 4 * act_bytes + (4 << 20),
                             32 << 20), 56 << 20))

    return pl.pallas_call(
        kernel,
        out_shape=jax.ShapeDtypeStruct((B, S, D), x.dtype),
        grid=(B // TB, n_blocks),
        in_specs=[pl.BlockSpec((TB, S, D), lambda b, l: (b, 0, 0))]
                 + [wspec(w) for w in weights],
        out_specs=pl.BlockSpec((TB, S, D), lambda b, l: (b, 0, 0)),
        scratch_shapes=[
            pltpu.VMEM((TB * S, qkv_w), jnp.float32),   # fused QKV staging
            pltpu.VMEM((TB * S, h_dv), jnp.float32),    # concat(heads) ctx
        ],
        compiler_params=pltpu.CompilerParams(
            dimension_semantics=("parallel", "arbitrary"),
            vmem_limit_bytes=vmem_limit),
    )(x, *weights)


def init_block_params(key, d_model, d_keys, d_values, n_heads, d_ff):
    """Deterministic synthetic parameters for one encoder block.

    Attention projections are fused: wqkv columns = [Wq | Wk | Wv] with heads
    contiguous inside each group (head h of Q at columns [h*dk,(h+1)*dk)).
    The 1/sqrt(d_keys) attention scale is folded into Wq / bq.  The output
    projection is (H*d_values, d_model) so concat(heads) @ Wo is one matmul.
    Matmul weights are bf16 (MXU operands); biases / LN params are f32."""
    ks = jax.random.split(key, 6)
    H = n_heads
    scale = 1.0 / math.sqrt(d_keys)

    def w(k, shape, fan_in):
        return jax.random.normal(k, shape, jnp.float32) / math.sqrt(fan_in)

    wq = w(ks[0], (d_model, H * d_keys), d_model) * scale      # scale folded
    wk = w(ks[1], (d_model, H * d_keys), d_model)
    wv = w(ks[2], (d_model, H * d_values), d_model)
    wo = w(ks[3], (H * d_values, d_model), H * d_values)
    wf1 = w(ks[4], (d_model, d_ff), d_model)
    wf2 = w(ks[5], (d_ff, d_model), d_ff)

    bq = jnp.zeros((H * d_keys,), jnp.float32) * scale          # scale folded
    bk = jnp.zeros((H * d_keys,), jnp.float32)
    bv = jnp.zeros((H * d_values,), jnp.float32)

    small = jnp.stack([
        jnp.zeros((d_model,), jnp.float32),   # bo
        jnp.ones((d_model,), jnp.float32),    # LN1 gamma
        jnp.zeros((d_model,), jnp.float32),   # LN1 beta
        jnp.zeros((d_model,), jnp.float32),   # bf2
        jnp.ones((d_model,), jnp.float32),    # LN2 gamma
        jnp.zeros((d_model,), jnp.float32),   # LN2 beta
    ])

    return {
        "wqkv": jnp.concatenate([wq, wk, wv], axis=1).astype(MATMUL_DTYPE),
        "bqkv": jnp.concatenate([bq, bk, bv])[None, :],
        "wo": wo.astype(MATMUL_DTYPE),
        "small": small,
        "wf1": wf1.astype(MATMUL_DTYPE),
        "bf1": jnp.zeros((1, d_ff), jnp.float32),
        "wf2": wf2.astype(MATMUL_DTYPE),
    }


def init_stacked_params(key, n_blocks, d_model, d_keys, d_values, n_heads, d_ff):
    keys = jax.random.split(key, n_blocks)
    per = [init_block_params(k, d_model, d_keys, d_values, n_heads, d_ff)
           for k in keys]
    return {name: jnp.stack([p[name] for p in per]) for name in _PARAM_ORDER}


def encoder_reference(x, stacked, *, n_heads, d_keys, d_values):
    """Pure-JAX f32 reference using the same (bf16-stored) parameters."""
    B, S, D = x.shape
    H, dk, dv = n_heads, d_keys, d_values
    out = x.astype(jnp.float32)
    for l in range(stacked["wqkv"].shape[0]):
        wqkv = stacked["wqkv"][l].astype(jnp.float32)
        bqkv = stacked["bqkv"][l][0]
        wo = stacked["wo"][l].astype(jnp.float32)
        small = stacked["small"][l]
        bo, g1, be1, bf2, g2, be2 = (small[i] for i in range(_N_SMALL))
        wf1 = stacked["wf1"][l].astype(jnp.float32)
        bf1 = stacked["bf1"][l][0]
        wf2 = stacked["wf2"][l].astype(jnp.float32)

        qkv = jnp.einsum("bsd,dw->bsw", out, wqkv) + bqkv
        q = qkv[..., :H * dk].reshape(B, S, H, dk)
        k = qkv[..., H * dk:2 * H * dk].reshape(B, S, H, dk)
        v = qkv[..., 2 * H * dk:].reshape(B, S, H, dv)
        s = jnp.einsum("bqhd,bkhd->bhqk", q, k)       # scale folded into Wq
        p = jax.nn.softmax(s, axis=-1)
        ctx = jnp.einsum("bhqk,bkhd->bqhd", p, v).reshape(B, S, H * dv)
        attn = ctx @ wo + bo
        h1 = _layer_norm(out + attn, g1, be1)
        f = jnp.maximum(h1 @ wf1 + bf1, 0.0) @ wf2 + bf2
        out = _layer_norm(h1 + f, g2, be2)
    return out


if __name__ == "__main__":
    # Small shapes consistent with the module's forward:
    # x: (batch=2, seq=8, d_model=32), n_heads=4, d_keys=d_values=8,
    # d_ff=64, n_blocks=2.
    B, S, D = 2, 8, 32
    n_heads, d_keys, d_values, d_ff, n_blocks = 4, 8, 8, 64, 2

    root = jax.random.PRNGKey(0)
    x_key, p_key = jax.random.split(root)

    x = jax.random.normal(x_key, (B, S, D), jnp.float32)
    params = init_stacked_params(p_key, n_blocks, D, d_keys, d_values,
                                 n_heads, d_ff)

    out = transformer_encoder_pallas(x, params, n_heads=n_heads,
                                     d_keys=d_keys, d_values=d_values)
    out = jax.block_until_ready(out)

    ref = encoder_reference(x, params, n_heads=n_heads, d_keys=d_keys,
                            d_values=d_values)
    err = float(jnp.max(jnp.abs(out.astype(jnp.float32) - ref)))

    assert out.shape == (B, S, D), out.shape
    assert bool(jnp.all(jnp.isfinite(out)))
    assert err < 5e-2, err
    print("KERNEL_OK")
</pallas_src>

<mosaic_0001>
module attributes {stable_mosaic.version = 11 : i64} {
  func.func @encoder_stack_kernel(%arg0: i32, %arg1: i32, %arg2: memref<2x8x32xf32, #tpu.memory_space<vmem>>, %arg3: memref<1x32x96xbf16, #tpu.memory_space<vmem>>, %arg4: memref<1x1x96xf32, #tpu.memory_space<vmem>>, %arg5: memref<1x32x32xbf16, #tpu.memory_space<vmem>>, %arg6: memref<1x6x32xf32, #tpu.memory_space<vmem>>, %arg7: memref<1x32x64xbf16, #tpu.memory_space<vmem>>, %arg8: memref<1x1x64xf32, #tpu.memory_space<vmem>>, %arg9: memref<1x64x32xbf16, #tpu.memory_space<vmem>>, %arg10: memref<2x8x32xf32, #tpu.memory_space<vmem>>, %arg11: memref<16x96xf32, #tpu.memory_space<vmem>>, %arg12: memref<16x32xf32, #tpu.memory_space<vmem>>) attributes {dimension_semantics = [#tpu.dimension_semantics<parallel>, #tpu.dimension_semantics<arbitrary>], iteration_bounds = array<i64: 1, 2>, scalar_prefetch = 0 : i64, scratch_operands = 2 : i64, tpu.core_type = #tpu.core_type<tc>, window_params = [{transform_indices = @transform_0, window_bounds = array<i64: 2, 8, 32>}, {transform_indices = @transform_1, window_bounds = array<i64: 1, 32, 96>}, {transform_indices = @transform_2, window_bounds = array<i64: 1, 1, 96>}, {transform_indices = @transform_3, window_bounds = array<i64: 1, 32, 32>}, {transform_indices = @transform_4, window_bounds = array<i64: 1, 6, 32>}, {transform_indices = @transform_5, window_bounds = array<i64: 1, 32, 64>}, {transform_indices = @transform_6, window_bounds = array<i64: 1, 1, 64>}, {transform_indices = @transform_7, window_bounds = array<i64: 1, 64, 32>}, {transform_indices = @transform_8, window_bounds = array<i64: 2, 8, 32>}]} {
    %c0_i32 = arith.constant 0 : i32
    %0 = arith.cmpi eq, %arg1, %c0_i32 : i32
    %1 = arith.extui %0 : i1 to i32
    %c0_i32_0 = arith.constant 0 : i32
    %2 = arith.cmpi ne, %1, %c0_i32_0 : i32
    scf.if %2 {
      %c0_82 = arith.constant 0 : index
      %c0_83 = arith.constant 0 : index
      %c0_84 = arith.constant 0 : index
      %185 = vector.load %arg2[%c0_82, %c0_83, %c0_84] : memref<2x8x32xf32, #tpu.memory_space<vmem>>, vector<2x8x32xf32>
      %c0_85 = arith.constant 0 : index
      %c0_86 = arith.constant 0 : index
      %c0_87 = arith.constant 0 : index
      %186 = vector.load %arg10[%c0_85, %c0_86, %c0_87] : memref<2x8x32xf32, #tpu.memory_space<vmem>>, vector<2x8x32xf32>
      tpu.vector_store %arg10[%c0_85, %c0_86, %c0_87], %185 {strides = array<i32>} : memref<2x8x32xf32, #tpu.memory_space<vmem>>, vector<2x8x32xf32>,
    } else {
    }
    %c0 = arith.constant 0 : index
    %c0_1 = arith.constant 0 : index
    %c0_2 = arith.constant 0 : index
    %3 = vector.load %arg10[%c0, %c0_1, %c0_2] : memref<2x8x32xf32, #tpu.memory_space<vmem>>, vector<2x8x32xf32>
    %4 = vector.shape_cast %3 : vector<2x8x32xf32> to vector<16x32xf32>
    %5 = arith.truncf %4 : vector<16x32xf32> to vector<16x32xbf16>
    %c0_3 = arith.constant 0 : index
    %c0_4 = arith.constant 0 : index
    %c0_5 = arith.constant 0 : index
    %6 = vector.load %arg3[%c0_3, %c0_4, %c0_5] : memref<1x32x96xbf16, #tpu.memory_space<vmem>>, vector<1x32x96xbf16>
    %7 = vector.shape_cast %6 : vector<1x32x96xbf16> to vector<32x96xbf16>
    %cst = arith.constant dense<0.000000e+00> : vector<16x96xf32>
    %8 = tpu.matmul %5, %7, %cst {dimension_numbers = #tpu.dot_dimension_numbers<[1], [0], [0], [1], [0, 0, 1, 1], [], []>} : vector<16x32xbf16>, vector<32x96xbf16>, vector<16x96xf32> -> vector<16x96xf32>
    %c0_6 = arith.constant 0 : index
    %c0_7 = arith.constant 0 : index
    %c0_8 = arith.constant 0 : index
    %9 = vector.load %arg4[%c0_6, %c0_7, %c0_8] : memref<1x1x96xf32, #tpu.memory_space<vmem>>, vector<1x1x96xf32>
    %10 = vector.shape_cast %9 : vector<1x1x96xf32> to vector<1x96xf32>
    %11 = vector.broadcast %10 : vector<1x96xf32> to vector<16x96xf32>
    %12 = arith.addf %8, %11 : vector<16x96xf32>
    %c0_9 = arith.constant 0 : index
    %c0_10 = arith.constant 0 : index
    %13 = vector.load %arg11[%c0_9, %c0_10] : memref<16x96xf32, #tpu.memory_space<vmem>>, vector<16x96xf32>
    tpu.vector_store %arg11[%c0_9, %c0_10], %12 {strides = array<i32>} : memref<16x96xf32, #tpu.memory_space<vmem>>, vector<16x96xf32>,
    %c0_11 = arith.constant 0 : index
    %c0_12 = arith.constant 0 : index
    %14 = vector.load %arg11[%c0_11, %c0_12] : memref<16x96xf32, #tpu.memory_space<vmem>>, vector<16x8xf32>
    %c0_13 = arith.constant 0 : index
    %c32 = arith.constant 32 : index
    %15 = vector.load %arg11[%c0_13, %c32] : memref<16x96xf32, #tpu.memory_space<vmem>>, vector<16x8xf32>
    %c0_14 = arith.constant 0 : index
    %c64 = arith.constant 64 : index
    %16 = vector.load %arg11[%c0_14, %c64] : memref<16x96xf32, #tpu.memory_space<vmem>>, vector<16x8xf32>
    %17 = vector.shape_cast %14 : vector<16x8xf32> to vector<2x8x8xf32>
    %18 = arith.truncf %17 : vector<2x8x8xf32> to vector<2x8x8xbf16>
    %19 = vector.shape_cast %15 : vector<16x8xf32> to vector<2x8x8xf32>
    %20 = arith.truncf %19 : vector<2x8x8xf32> to vector<2x8x8xbf16>
    %21 = vector.shape_cast %16 : vector<16x8xf32> to vector<2x8x8xf32>
    %22 = arith.truncf %21 : vector<2x8x8xf32> to vector<2x8x8xbf16>
    "tpu.trace_start"() <{level = 10 : i32, message = "bqd,bkd->bqk"}> : () -> ()
    %cst_15 = arith.constant dense<0.000000e+00> : vector<2x8x8xf32>
    %23 = tpu.matmul %18, %20, %cst_15 {dimension_numbers = #tpu.dot_dimension_numbers<[2], [2], [1], [1], [0, 0, 0, 1, 1, 1], [0], [0]>} : vector<2x8x8xbf16>, vector<2x8x8xbf16>, vector<2x8x8xf32> -> vector<2x8x8xf32>
    "tpu.trace_stop"() : () -> ()
    %cst_16 = arith.constant dense<0xFF800000> : vector<2x8xf32>
    %24 = vector.multi_reduction <maximumf>, %23, %cst_16 [2] : vector<2x8x8xf32> to vector<2x8xf32>
    %25 = vector.shape_cast %24 : vector<2x8xf32> to vector<2x8x1xf32>
    %26 = vector.broadcast %25 : vector<2x8x1xf32> to vector<2x8x8xf32>
    %27 = arith.subf %23, %26 : vector<2x8x8xf32>
    %28 = math.exp %27 : vector<2x8x8xf32>
    %cst_17 = arith.constant dense<0.000000e+00> : vector<2x8xf32>
    %29 = vector.multi_reduction <add>, %28, %cst_17 [2] : vector<2x8x8xf32> to vector<2x8xf32>
    %30 = vector.shape_cast %29 : vector<2x8xf32> to vector<2x8x1xf32>
    %31 = tpu.reciprocal %30 {approx = true} : vector<2x8x1xf32> -> vector<2x8x1xf32>
    %32 = vector.broadcast %31 : vector<2x8x1xf32> to vector<2x8x8xf32>
    %33 = arith.mulf %28, %32 : vector<2x8x8xf32>
    %34 = arith.truncf %33 : vector<2x8x8xf32> to vector<2x8x8xbf16>
    "tpu.trace_start"() <{level = 10 : i32, message = "bqk,bkd->bqd"}> : () -> ()
    %cst_18 = arith.constant dense<0.000000e+00> : vector<2x8x8xf32>
    %35 = tpu.matmul %34, %22, %cst_18 {dimension_numbers = #tpu.dot_dimension_numbers<[2], [1], [1], [2], [0, 0, 0, 1, 1, 2], [0], [0]>} : vector<2x8x8xbf16>, vector<2x8x8xbf16>, vector<2x8x8xf32> -> vector<2x8x8xf32>
    "tpu.trace_stop"() : () -> ()
    %36 = vector.shape_cast %35 : vector<2x8x8xf32> to vector<16x8xf32>
    %c0_19 = arith.constant 0 : index
    %c0_20 = arith.constant 0 : index
    %37 = vector.load %arg12[%c0_19, %c0_20] : memref<16x32xf32, #tpu.memory_space<vmem>>, vector<16x8xf32>
    tpu.vector_store %arg12[%c0_19, %c0_20], %36 {strides = array<i32>} : memref<16x32xf32, #tpu.memory_space<vmem>>, vector<16x8xf32>,
    %c0_21 = arith.constant 0 : index
    %c8 = arith.constant 8 : index
    %38 = vector.load %arg11[%c0_21, %c8] : memref<16x96xf32, #tpu.memory_space<vmem>>, vector<16x8xf32>
    %c0_22 = arith.constant 0 : index
    %c40 = arith.constant 40 : index
    %39 = vector.load %arg11[%c0_22, %c40] : memref<16x96xf32, #tpu.memory_space<vmem>>, vector<16x8xf32>
    %c0_23 = arith.constant 0 : index
    %c72 = arith.constant 72 : index
    %40 = vector.load %arg11[%c0_23, %c72] : memref<16x96xf32, #tpu.memory_space<vmem>>, vector<16x8xf32>
    %41 = vector.shape_cast %38 : vector<16x8xf32> to vector<2x8x8xf32>
    %42 = arith.truncf %41 : vector<2x8x8xf32> to vector<2x8x8xbf16>
    %43 = vector.shape_cast %39 : vector<16x8xf32> to vector<2x8x8xf32>
    %44 = arith.truncf %43 : vector<2x8x8xf32> to vector<2x8x8xbf16>
    %45 = vector.shape_cast %40 : vector<16x8xf32> to vector<2x8x8xf32>
    %46 = arith.truncf %45 : vector<2x8x8xf32> to vector<2x8x8xbf16>
    "tpu.trace_start"() <{level = 10 : i32, message = "bqd,bkd->bqk"}> : () -> ()
    %cst_24 = arith.constant dense<0.000000e+00> : vector<2x8x8xf32>
    %47 = tpu.matmul %42, %44, %cst_24 {dimension_numbers = #tpu.dot_dimension_numbers<[2], [2], [1], [1], [0, 0, 0, 1, 1, 1], [0], [0]>} : vector<2x8x8xbf16>, vector<2x8x8xbf16>, vector<2x8x8xf32> -> vector<2x8x8xf32>
    "tpu.trace_stop"() : () -> ()
    %cst_25 = arith.constant dense<0xFF800000> : vector<2x8xf32>
    %48 = vector.multi_reduction <maximumf>, %47, %cst_25 [2] : vector<2x8x8xf32> to vector<2x8xf32>
    %49 = vector.shape_cast %48 : vector<2x8xf32> to vector<2x8x1xf32>
    %50 = vector.broadcast %49 : vector<2x8x1xf32> to vector<2x8x8xf32>
    %51 = arith.subf %47, %50 : vector<2x8x8xf32>
    %52 = math.exp %51 : vector<2x8x8xf32>
    %cst_26 = arith.constant dense<0.000000e+00> : vector<2x8xf32>
    %53 = vector.multi_reduction <add>, %52, %cst_26 [2] : vector<2x8x8xf32> to vector<2x8xf32>
    %54 = vector.shape_cast %53 : vector<2x8xf32> to vector<2x8x1xf32>
    %55 = tpu.reciprocal %54 {approx = true} : vector<2x8x1xf32> -> vector<2x8x1xf32>
    %56 = vector.broadcast %55 : vector<2x8x1xf32> to vector<2x8x8xf32>
    %57 = arith.mulf %52, %56 : vector<2x8x8xf32>
    %58 = arith.truncf %57 : vector<2x8x8xf32> to vector<2x8x8xbf16>
    "tpu.trace_start"() <{level = 10 : i32, message = "bqk,bkd->bqd"}> : () -> ()
    %cst_27 = arith.constant dense<0.000000e+00> : vector<2x8x8xf32>
    %59 = tpu.matmul %58, %46, %cst_27 {dimension_numbers = #tpu.dot_dimension_numbers<[2], [1], [1], [2], [0, 0, 0, 1, 1, 2], [0], [0]>} : vector<2x8x8xbf16>, vector<2x8x8xbf16>, vector<2x8x8xf32> -> vector<2x8x8xf32>
    "tpu.trace_stop"() : () -> ()
    %60 = vector.shape_cast %59 : vector<2x8x8xf32> to vector<16x8xf32>
    %c0_28 = arith.constant 0 : index
    %c8_29 = arith.constant 8 : index
    %61 = vector.load %arg12[%c0_28, %c8_29] : memref<16x32xf32, #tpu.memory_space<vmem>>, vector<16x8xf32>
    tpu.vector_store %arg12[%c0_28, %c8_29], %60 {strides = array<i32>} : memref<16x32xf32, #tpu.memory_space<vmem>>, vector<16x8xf32>,
    %c0_30 = arith.constant 0 : index
    %c16 = arith.constant 16 : index
    %62 = vector.load %arg11[%c0_30, %c16] : memref<16x96xf32, #tpu.memory_space<vmem>>, vector<16x8xf32>
    %c0_31 = arith.constant 0 : index
    %c48 = arith.constant 48 : index
    %63 = vector.load %arg11[%c0_31, %c48] : memref<16x96xf32, #tpu.memory_space<vmem>>, vector<16x8xf32>
    %c0_32 = arith.constant 0 : index
    %c80 = arith.constant 80 : index
    %64 = vector.load %arg11[%c0_32, %c80] : memref<16x96xf32, #tpu.memory_space<vmem>>, vector<16x8xf32>
    %65 = vector.shape_cast %62 : vector<16x8xf32> to vector<2x8x8xf32>
    %66 = arith.truncf %65 : vector<2x8x8xf32> to vector<2x8x8xbf16>
    %67 = vector.shape_cast %63 : vector<16x8xf32> to vector<2x8x8xf32>
    %68 = arith.truncf %67 : vector<2x8x8xf32> to vector<2x8x8xbf16>
    %69 = vector.shape_cast %64 : vector<16x8xf32> to vector<2x8x8xf32>
    %70 = arith.truncf %69 : vector<2x8x8xf32> to vector<2x8x8xbf16>
    "tpu.trace_start"() <{level = 10 : i32, message = "bqd,bkd->bqk"}> : () -> ()
    %cst_33 = arith.constant dense<0.000000e+00> : vector<2x8x8xf32>
    %71 = tpu.matmul %66, %68, %cst_33 {dimension_numbers = #tpu.dot_dimension_numbers<[2], [2], [1], [1], [0, 0, 0, 1, 1, 1], [0], [0]>} : vector<2x8x8xbf16>, vector<2x8x8xbf16>, vector<2x8x8xf32> -> vector<2x8x8xf32>
    "tpu.trace_stop"() : () -> ()
    %cst_34 = arith.constant dense<0xFF800000> : vector<2x8xf32>
    %72 = vector.multi_reduction <maximumf>, %71, %cst_34 [2] : vector<2x8x8xf32> to vector<2x8xf32>
    %73 = vector.shape_cast %72 : vector<2x8xf32> to vector<2x8x1xf32>
    %74 = vector.broadcast %73 : vector<2x8x1xf32> to vector<2x8x8xf32>
    %75 = arith.subf %71, %74 : vector<2x8x8xf32>
    %76 = math.exp %75 : vector<2x8x8xf32>
    %cst_35 = arith.constant dense<0.000000e+00> : vector<2x8xf32>
    %77 = vector.multi_reduction <add>, %76, %cst_35 [2] : vector<2x8x8xf32> to vector<2x8xf32>
    %78 = vector.shape_cast %77 : vector<2x8xf32> to vector<2x8x1xf32>
    %79 = tpu.reciprocal %78 {approx = true} : vector<2x8x1xf32> -> vector<2x8x1xf32>
    %80 = vector.broadcast %79 : vector<2x8x1xf32> to vector<2x8x8xf32>
    %81 = arith.mulf %76, %80 : vector<2x8x8xf32>
    %82 = arith.truncf %81 : vector<2x8x8xf32> to vector<2x8x8xbf16>
    "tpu.trace_start"() <{level = 10 : i32, message = "bqk,bkd->bqd"}> : () -> ()
    %cst_36 = arith.constant dense<0.000000e+00> : vector<2x8x8xf32>
    %83 = tpu.matmul %82, %70, %cst_36 {dimension_numbers = #tpu.dot_dimension_numbers<[2], [1], [1], [2], [0, 0, 0, 1, 1, 2], [0], [0]>} : vector<2x8x8xbf16>, vector<2x8x8xbf16>, vector<2x8x8xf32> -> vector<2x8x8xf32>
    "tpu.trace_stop"() : () -> ()
    %84 = vector.shape_cast %83 : vector<2x8x8xf32> to vector<16x8xf32>
    %c0_37 = arith.constant 0 : index
    %c16_38 = arith.constant 16 : index
    %85 = vector.load %arg12[%c0_37, %c16_38] : memref<16x32xf32, #tpu.memory_space<vmem>>, vector<16x8xf32>
    tpu.vector_store %arg12[%c0_37, %c16_38], %84 {strides = array<i32>} : memref<16x32xf32, #tpu.memory_space<vmem>>, vector<16x8xf32>,
    %c0_39 = arith.constant 0 : index
    %c24 = arith.constant 24 : index
    %86 = vector.load %arg11[%c0_39, %c24] : memref<16x96xf32, #tpu.memory_space<vmem>>, vector<16x8xf32>
    %c0_40 = arith.constant 0 : index
    %c56 = arith.constant 56 : index
    %87 = vector.load %arg11[%c0_40, %c56] : memref<16x96xf32, #tpu.memory_space<vmem>>, vector<16x8xf32>
    %c0_41 = arith.constant 0 : index
    %c88 = arith.constant 88 : index
    %88 = vector.load %arg11[%c0_41, %c88] : memref<16x96xf32, #tpu.memory_space<vmem>>, vector<16x8xf32>
    %89 = vector.shape_cast %86 : vector<16x8xf32> to vector<2x8x8xf32>
    %90 = arith.truncf %89 : vector<2x8x8xf32> to vector<2x8x8xbf16>
    %91 = vector.shape_cast %87 : vector<16x8xf32> to vector<2x8x8xf32>
    %92 = arith.truncf %91 : vector<2x8x8xf32> to vector<2x8x8xbf16>
    %93 = vector.shape_cast %88 : vector<16x8xf32> to vector<2x8x8xf32>
    %94 = arith.truncf %93 : vector<2x8x8xf32> to vector<2x8x8xbf16>
    "tpu.trace_start"() <{level = 10 : i32, message = "bqd,bkd->bqk"}> : () -> ()
    %cst_42 = arith.constant dense<0.000000e+00> : vector<2x8x8xf32>
    %95 = tpu.matmul %90, %92, %cst_42 {dimension_numbers = #tpu.dot_dimension_numbers<[2], [2], [1], [1], [0, 0, 0, 1, 1, 1], [0], [0]>} : vector<2x8x8xbf16>, vector<2x8x8xbf16>, vector<2x8x8xf32> -> vector<2x8x8xf32>
    "tpu.trace_stop"() : () -> ()
    %cst_43 = arith.constant dense<0xFF800000> : vector<2x8xf32>
    %96 = vector.multi_reduction <maximumf>, %95, %cst_43 [2] : vector<2x8x8xf32> to vector<2x8xf32>
    %97 = vector.shape_cast %96 : vector<2x8xf32> to vector<2x8x1xf32>
    %98 = vector.broadcast %97 : vector<2x8x1xf32> to vector<2x8x8xf32>
    %99 = arith.subf %95, %98 : vector<2x8x8xf32>
    %100 = math.exp %99 : vector<2x8x8xf32>
    %cst_44 = arith.constant dense<0.000000e+00> : vector<2x8xf32>
    %101 = vector.multi_reduction <add>, %100, %cst_44 [2] : vector<2x8x8xf32> to vector<2x8xf32>
    %102 = vector.shape_cast %101 : vector<2x8xf32> to vector<2x8x1xf32>
    %103 = tpu.reciprocal %102 {approx = true} : vector<2x8x1xf32> -> vector<2x8x1xf32>
    %104 = vector.broadcast %103 : vector<2x8x1xf32> to vector<2x8x8xf32>
    %105 = arith.mulf %100, %104 : vector<2x8x8xf32>
    %106 = arith.truncf %105 : vector<2x8x8xf32> to vector<2x8x8xbf16>
    "tpu.trace_start"() <{level = 10 : i32, message = "bqk,bkd->bqd"}> : () -> ()
    %cst_45 = arith.constant dense<0.000000e+00> : vector<2x8x8xf32>
    %107 = tpu.matmul %106, %94, %cst_45 {dimension_numbers = #tpu.dot_dimension_numbers<[2], [1], [1], [2], [0, 0, 0, 1, 1, 2], [0], [0]>} : vector<2x8x8xbf16>, vector<2x8x8xbf16>, vector<2x8x8xf32> -> vector<2x8x8xf32>
    "tpu.trace_stop"() : () -> ()
    %108 = vector.shape_cast %107 : vector<2x8x8xf32> to vector<16x8xf32>
    %c0_46 = arith.constant 0 : index
    %c24_47 = arith.constant 24 : index
    %109 = vector.load %arg12[%c0_46, %c24_47] : memref<16x32xf32, #tpu.memory_space<vmem>>, vector<16x8xf32>
    tpu.vector_store %arg12[%c0_46, %c24_47], %108 {strides = array<i32>} : memref<16x32xf32, #tpu.memory_space<vmem>>, vector<16x8xf32>,
    %c0_48 = arith.constant 0 : index
    %c0_49 = arith.constant 0 : index
    %c0_50 = arith.constant 0 : index
    %110 = vector.load %arg6[%c0_48, %c0_49, %c0_50] : memref<1x6x32xf32, #tpu.memory_space<vmem>>, vector<1x6x32xf32>
    %111 = vector.shape_cast %110 : vector<1x6x32xf32> to vector<6x32xf32>
    %112 = vector.extract_strided_slice %111 {offsets = [0, 0], sizes = [1, 32], strides = [1, 1]} : vector<6x32xf32> to vector<1x32xf32>
    %113 = vector.extract_strided_slice %111 {offsets = [1, 0], sizes = [1, 32], strides = [1, 1]} : vector<6x32xf32> to vector<1x32xf32>
    %114 = vector.extract_strided_slice %111 {offsets = [2, 0], sizes = [1, 32], strides = [1, 1]} : vector<6x32xf32> to vector<1x32xf32>
    %115 = vector.extract_strided_slice %111 {offsets = [3, 0], sizes = [1, 32], strides = [1, 1]} : vector<6x32xf32> to vector<1x32xf32>
    %116 = vector.extract_strided_slice %111 {offsets = [4, 0], sizes = [1, 32], strides = [1, 1]} : vector<6x32xf32> to vector<1x32xf32>
    %117 = vector.extract_strided_slice %111 {offsets = [5, 0], sizes = [1, 32], strides = [1, 1]} : vector<6x32xf32> to vector<1x32xf32>
    %c0_51 = arith.constant 0 : index
    %c0_52 = arith.constant 0 : index
    %118 = vector.load %arg12[%c0_51, %c0_52] : memref<16x32xf32, #tpu.memory_space<vmem>>, vector<16x32xf32>
    %119 = arith.truncf %118 : vector<16x32xf32> to vector<16x32xbf16>
    %c0_53 = arith.constant 0 : index
    %c0_54 = arith.constant 0 : index
    %c0_55 = arith.constant 0 : index
    %120 = vector.load %arg5[%c0_53, %c0_54, %c0_55] : memref<1x32x32xbf16, #tpu.memory_space<vmem>>, vector<1x32x32xbf16>
    %121 = vector.shape_cast %120 : vector<1x32x32xbf16> to vector<32x32xbf16>
    %cst_56 = arith.constant dense<0.000000e+00> : vector<16x32xf32>
    %122 = tpu.matmul %119, %121, %cst_56 {dimension_numbers = #tpu.dot_dimension_numbers<[1], [0], [0], [1], [0, 0, 1, 1], [], []>} : vector<16x32xbf16>, vector<32x32xbf16>, vector<16x32xf32> -> vector<16x32xf32>
    %123 = vector.broadcast %112 : vector<1x32xf32> to vector<16x32xf32>
    %124 = arith.addf %122, %123 : vector<16x32xf32>
    %125 = arith.addf %4, %124 : vector<16x32xf32>
    %cst_57 = arith.constant dense<0.000000e+00> : vector<16xf32>
    %126 = vector.multi_reduction <add>, %125, %cst_57 [1] : vector<16x32xf32> to vector<16xf32>
    %127 = vector.shape_cast %126 : vector<16xf32> to vector<16x1xf32>
    %cst_58 = arith.constant 3.200000e+01 : f32
    %128 = vector.broadcast %cst_58 : f32 to vector<16x1xf32>
    %129 = arith.divf %127, %128 : vector<16x1xf32>
    %130 = vector.broadcast %129 : vector<16x1xf32> to vector<16x32xf32>
    %131 = arith.subf %125, %130 : vector<16x32xf32>
    %132 = arith.mulf %131, %131 : vector<16x32xf32>
    %cst_59 = arith.constant dense<0.000000e+00> : vector<16xf32>
    %133 = vector.multi_reduction <add>, %132, %cst_59 [1] : vector<16x32xf32> to vector<16xf32>
    %134 = vector.shape_cast %133 : vector<16xf32> to vector<16x1xf32>
    %cst_60 = arith.constant 3.200000e+01 : f32
    %135 = vector.broadcast %cst_60 : f32 to vector<16x1xf32>
    %136 = arith.divf %134, %135 : vector<16x1xf32>
    %cst_61 = arith.constant 9.99999974E-6 : f32
    %137 = vector.broadcast %cst_61 : f32 to vector<16x1xf32>
    %138 = arith.addf %136, %137 : vector<16x1xf32>
    %139 = math.rsqrt %138 : vector<16x1xf32>
    %140 = vector.broadcast %139 : vector<16x1xf32> to vector<16x32xf32>
    %141 = vector.broadcast %113 : vector<1x32xf32> to vector<16x32xf32>
    %142 = arith.mulf %140, %141 : vector<16x32xf32>
    %143 = arith.mulf %131, %142 : vector<16x32xf32>
    %144 = vector.broadcast %114 : vector<1x32xf32> to vector<16x32xf32>
    %145 = arith.addf %143, %144 : vector<16x32xf32>
    %146 = arith.truncf %145 : vector<16x32xf32> to vector<16x32xbf16>
    %c0_62 = arith.constant 0 : index
    %c0_63 = arith.constant 0 : index
    %c0_64 = arith.constant 0 : index
    %147 = vector.load %arg7[%c0_62, %c0_63, %c0_64] : memref<1x32x64xbf16, #tpu.memory_space<vmem>>, vector<1x32x64xbf16>
    %148 = vector.shape_cast %147 : vector<1x32x64xbf16> to vector<32x64xbf16>
    %cst_65 = arith.constant dense<0.000000e+00> : vector<16x64xf32>
    %149 = tpu.matmul %146, %148, %cst_65 {dimension_numbers = #tpu.dot_dimension_numbers<[1], [0], [0], [1], [0, 0, 1, 1], [], []>} : vector<16x32xbf16>, vector<32x64xbf16>, vector<16x64xf32> -> vector<16x64xf32>
    %c0_66 = arith.constant 0 : index
    %c0_67 = arith.constant 0 : index
    %c0_68 = arith.constant 0 : index
    %150 = vector.load %arg8[%c0_66, %c0_67, %c0_68] : memref<1x1x64xf32, #tpu.memory_space<vmem>>, vector<1x1x64xf32>
    %151 = vector.shape_cast %150 : vector<1x1x64xf32> to vector<1x64xf32>
    %152 = vector.broadcast %151 : vector<1x64xf32> to vector<16x64xf32>
    %153 = arith.addf %149, %152 : vector<16x64xf32>
    %cst_69 = arith.constant 0.000000e+00 : f32
    %154 = vector.broadcast %cst_69 : f32 to vector<16x64xf32>
    %155 = arith.maximumf %153, %154 : vector<16x64xf32>
    %156 = arith.truncf %155 : vector<16x64xf32> to vector<16x64xbf16>
    %c0_70 = arith.constant 0 : index
    %c0_71 = arith.constant 0 : index
    %c0_72 = arith.constant 0 : index
    %157 = vector.load %arg9[%c0_70, %c0_71, %c0_72] : memref<1x64x32xbf16, #tpu.memory_space<vmem>>, vector<1x64x32xbf16>
    %158 = vector.shape_cast %157 : vector<1x64x32xbf16> to vector<64x32xbf16>
    %cst_73 = arith.constant dense<0.000000e+00> : vector<16x32xf32>
    %159 = tpu.matmul %156, %158, %cst_73 {dimension_numbers = #tpu.dot_dimension_numbers<[1], [0], [0], [1], [0, 0, 1, 1], [], []>} : vector<16x64xbf16>, vector<64x32xbf16>, vector<16x32xf32> -> vector<16x32xf32>
    %160 = vector.broadcast %115 : vector<1x32xf32> to vector<16x32xf32>
    %161 = arith.addf %159, %160 : vector<16x32xf32>
    %162 = arith.addf %145, %161 : vector<16x32xf32>
    %cst_74 = arith.constant dense<0.000000e+00> : vector<16xf32>
    %163 = vector.multi_reduction <add>, %162, %cst_74 [1] : vector<16x32xf32> to vector<16xf32>
    %164 = vector.shape_cast %163 : vector<16xf32> to vector<16x1xf32>
    %cst_75 = arith.constant 3.200000e+01 : f32
    %165 = vector.broadcast %cst_75 : f32 to vector<16x1xf32>
    %166 = arith.divf %164, %165 : vector<16x1xf32>
    %167 = vector.broadcast %166 : vector<16x1xf32> to vector<16x32xf32>
    %168 = arith.subf %162, %167 : vector<16x32xf32>
    %169 = arith.mulf %168, %168 : vector<16x32xf32>
    %cst_76 = arith.constant dense<0.000000e+00> : vector<16xf32>
    %170 = vector.multi_reduction <add>, %169, %cst_76 [1] : vector<16x32xf32> to vector<16xf32>
    %171 = vector.shape_cast %170 : vector<16xf32> to vector<16x1xf32>
    %cst_77 = arith.constant 3.200000e+01 : f32
    %172 = vector.broadcast %cst_77 : f32 to vector<16x1xf32>
    %173 = arith.divf %171, %172 : vector<16x1xf32>
    %cst_78 = arith.constant 9.99999974E-6 : f32
    %174 = vector.broadcast %cst_78 : f32 to vector<16x1xf32>
    %175 = arith.addf %173, %174 : vector<16x1xf32>
    %176 = math.rsqrt %175 : vector<16x1xf32>
    %177 = vector.broadcast %176 : vector<16x1xf32> to vector<16x32xf32>
    %178 = vector.broadcast %116 : vector<1x32xf32> to vector<16x32xf32>
    %179 = arith.mulf %177, %178 : vector<16x32xf32>
    %180 = arith.mulf %168, %179 : vector<16x32xf32>
    %181 = vector.broadcast %117 : vector<1x32xf32> to vector<16x32xf32>
    %182 = arith.addf %180, %181 : vector<16x32xf32>
    %183 = vector.shape_cast %182 : vector<16x32xf32> to vector<2x8x32xf32>
    %c0_79 = arith.constant 0 : index
    %c0_80 = arith.constant 0 : index
    %c0_81 = arith.constant 0 : index
    %184 = vector.load %arg10[%c0_79, %c0_80, %c0_81] : memref<2x8x32xf32, #tpu.memory_space<vmem>>, vector<2x8x32xf32>
    tpu.vector_store %arg10[%c0_79, %c0_80, %c0_81], %183 {strides = array<i32>} : memref<2x8x32xf32, #tpu.memory_space<vmem>>, vector<2x8x32xf32>,
    return
  }
  func.func @transform_0(%arg0: i32, %arg1: i32) -> (i32, i32, i32) {
    %c0_i32 = arith.constant 0 : i32
    %c0_i32_0 = arith.constant 0 : i32
    %c0_i32_1 = arith.constant 0 : i32
    return %arg0, %c0_i32, %c0_i32_0 : i32, i32, i32
  }
  func.func @transform_1(%arg0: i32, %arg1: i32) -> (i32, i32, i32) {
    %c0_i32 = arith.constant 0 : i32
    %c0_i32_0 = arith.constant 0 : i32
    %c0_i32_1 = arith.constant 0 : i32
    return %arg1, %c0_i32, %c0_i32_0 : i32, i32, i32
  }
  func.func @transform_2(%arg0: i32, %arg1: i32) -> (i32, i32, i32) {
    %c0_i32 = arith.constant 0 : i32
    %c0_i32_0 = arith.constant 0 : i32
    %c0_i32_1 = arith.constant 0 : i32
    return %arg1, %c0_i32, %c0_i32_0 : i32, i32, i32
  }
  func.func @transform_3(%arg0: i32, %arg1: i32) -> (i32, i32, i32) {
    %c0_i32 = arith.constant 0 : i32
    %c0_i32_0 = arith.constant 0 : i32
    %c0_i32_1 = arith.constant 0 : i32
    return %arg1, %c0_i32, %c0_i32_0 : i32, i32, i32
  }
  func.func @transform_4(%arg0: i32, %arg1: i32) -> (i32, i32, i32) {
    %c0_i32 = arith.constant 0 : i32
    %c0_i32_0 = arith.constant 0 : i32
    %c0_i32_1 = arith.constant 0 : i32
    return %arg1, %c0_i32, %c0_i32_0 : i32, i32, i32
  }
  func.func @transform_5(%arg0: i32, %arg1: i32) -> (i32, i32, i32) {
    %c0_i32 = arith.constant 0 : i32
    %c0_i32_0 = arith.constant 0 : i32
    %c0_i32_1 = arith.constant 0 : i32
    return %arg1, %c0_i32, %c0_i32_0 : i32, i32, i32
  }
  func.func @transform_6(%arg0: i32, %arg1: i32) -> (i32, i32, i32) {
    %c0_i32 = arith.constant 0 : i32
    %c0_i32_0 = arith.constant 0 : i32
    %c0_i32_1 = arith.constant 0 : i32
    return %arg1, %c0_i32, %c0_i32_0 : i32, i32, i32
  }
  func.func @transform_7(%arg0: i32, %arg1: i32) -> (i32, i32, i32) {
    %c0_i32 = arith.constant 0 : i32
    %c0_i32_0 = arith.constant 0 : i32
    %c0_i32_1 = arith.constant 0 : i32
    return %arg1, %c0_i32, %c0_i32_0 : i32, i32, i32
  }
  func.func @transform_8(%arg0: i32, %arg1: i32) -> (i32, i32, i32) {
    %c0_i32 = arith.constant 0 : i32
    %c0_i32_0 = arith.constant 0 : i32
    %c0_i32_1 = arith.constant 0 : i32
    return %arg0, %c0_i32, %c0_i32_0 : i32, i32, i32
  }
}

</mosaic_0001>

<bundles_post_ra>
// kernel: tpu_custom_call.1
= control target key start
LH: loop header
LB: loop body
LE: loop exit
PB: predicated region body
PF: predicated region fallthrough
CT: control target
= control target key end

     0   :  { %13 = vsyncpa [#allocation5], 0  ;;  %s2720_s0 = inlined_call_operand.hbm [shape: f32[2,8,32], index: 0, kind: input, shape index: {}]   ;;  %s2721_s1 = inlined_call_operand.vmem [shape: bf16[2,32,96], index: 1, kind: input, shape index: {}]   ;;  %s2722_s2 = inlined_call_operand.vmem [shape: f32[2,1,96], index: 2, kind: input, shape index: {}]   ;;  %s2723_s3 = inlined_call_operand.vmem [shape: bf16[2,32,32], index: 3, kind: input, shape index: {}]   ;;  %s2724_s4 = inlined_call_operand.vmem [shape: f32[2,6,32], index: 4, kind: input, shape index: {}]   ;;  %s2725_s5 = inlined_call_operand.vmem [shape: bf16[2,32,64], index: 5, kind: input, shape index: {}]   ;;  %s2726_s6 = inlined_call_operand.vmem [shape: f32[2,1,64], index: 6, kind: input, shape index: {}]   ;;  %s2727_s7 = inlined_call_operand.vmem [shape: bf16[2,64,32], index: 7, kind: input, shape index: {}]   ;;  %s2728_s8 = inlined_call_operand.hbm [shape: f32[2,8,32], index: 8, kind: output, shape index: {}]  }
   0x1   :  { %14 = vsyncpa [#allocation6], 0  ;;  %s2398_s27 = smov 0   ;;  %s2400_s28 = smov 0  }
   0x2   :  { %s2402_s29 = smov 0  }
   0x3 LB: > { %s2729_s30 = sadd.s32 4294967295, %s2330_s29   ;;  %s29_s9 = sadd.s32 1, %s2326_s28  ;;  %s2330_s29 = sphi %s2402_s29, %s20_s29   ;;  %s2326_s28 = sphi %s2400_s28, %s2736_s28   ;;  %s2322_s27 = sphi %s2398_s27, %s2735_s27  }
   0x4   : > { %p30_p0 = scmp.ge.s32.totalorder %s29_s9, 2  ;;  %p1906_p1 = scmp.ge.s32.totalorder %s2330_s29, 1 }
   0x5   : > { %p271_p2 = scmp.lt.s32.totalorder %s2330_s29, 3  ;;  %p2425_p4 = scmp.eq.s32.totalorder %s2729_s30, 0 }
   0x6   : > { %s2738_s9 = smov (%p30_p0, %s29_s9), 0  ;;  %s2332_s12 = smov [#allocation4]  }
   0x7   : > { %p2419_p3 = pnand %p1906_p1, %p271_p2  ;;  %s286_s13 = sshll.u32 %s2332_s12, 4  ;;  %s287_s13 = int_to_ptr.vmem [resolvable:$true] %s286_s13 }
   0x8   : > { %s2261_s14 = scalar_lea.vmem %s287_s13, 256  ;;  %p2269_p11 = scmp.lt.s32.totalorder %s287_s13, %s287_s13 }
   0x9   : > { %p2147_p5 = pneg %p2419_p3  ;;  %p2262_p8 = scmp.ne.s32.totalorder %s287_s13, %s2261_s14 }
   0xa   : > { %p2270_p12 = scmp.lt.s32.totalorder %s2261_s14, %s2261_s14 }
   0xb   : > { %p2148_p6 = pnand %p2425_p4, %p2147_p5 }
   0xc   : > { %p2271_p13 = por %p2270_p12, %p2269_p11 }
   0xd   : > { %p2252_p7 = pneg %p2148_p6 }
   0xf   : > { %p2264_p9 = pnand %p2262_p8, %p2252_p7 }
  0x11   : > { %p2265_p10 = pneg %p2264_p9 }
  0x13   : > { %p2272_p0 = pnand %p2271_p13, %p2265_p10 }
  0x15   : > { %2275 = shalt.err (!%p2272_p0)
}
  0x16   : > { %s2333_s15 = smov 128   ;;  %s2334_s16 = smov 8  }
  0x17   : > { %2150 = dma.hbm_to_vmem [thread:$0]  (!%p2148_p6), %s2720_s0, 256, %s287_s13, [#allocation5], %s2333_s15, %s2333_s15, %s2334_s16  }
  0x18   : > { %353 = sbr.rel (%p2419_p3) target bundleno = 3985 (0xf91), region = 52 }
  0x1d   : > { %2313 = dma.done.wait (%p2425_p4), [#allocation5], 256  }
  0x1e   : > { %2315 = vsyncadd (%p2425_p4), [#allocation5], 4294967040  ;;  %p408_p1 = scmp.lt.s32.totalorder %s2322_s27, 1  ;;  %p1920_p2 = scmp.ne.s32.totalorder %s2322_s27, 0 }
  0x20   : > { %s2444_s19 = scalar_select %p408_p1, %s2322_s27, 1 }
  0x22   : > { %s1957_s20 = sshll.u32 %s2444_s19, 4  ;;  %s1915_s13 = sshll.u32 %s2444_s19, 3 }
  0x23   : > { %s412_s26 = scalar_lea.vmem %s2721_s1, %s1957_s20  ;;  %s2457_s12 = scalar_lea.vmem %s2723_s3, %s1957_s20 }
  0x24   : > { %s2463_s16 = scalar_lea.vmem %s2725_s5, %s1957_s20  ;;  %s2468_s21 = scalar_lea.vmem %s2724_s4, %s1915_s13 }
  0x25   : > { %s432_s24 = scalar_lea.vmem %s2726_s6, %s2444_s19  ;;  %s1960_s25 = sshll.u32 %s2444_s19, 5 }
  0x26   : > { %s2478_s11 = scalar_lea.vmem %s2727_s7, %s1960_s25  ;;  %443 = sbr.rel (%p1920_p2) target bundleno = 45 (0x2d), region = 60 }
  0x2b   : > { %v444_v0 = vld [vmem:[#allocation4] sm:$0xff]  ;;  %vm446_vm0 = vcmask 261120   ;;  %v445_v1 = vld [vmem:[#allocation4 + $0x8] sm:$0xff] }
  0x2c   : > { %447 = vst.msk [vmem:[#allocation7] sm:$0xff] %vm446_vm0, %v444_v0  ;;  %448 = vst.msk [vmem:[#allocation7 + $0x8] sm:$0xff] %vm446_vm0, %v445_v1 }
  0x2d PF: > { %v2200_v2 = vld [vmem:[%s412_s26 + $0x8] sm:$0xff]   ;;  %v2335_v3 = vmov 0.0   ;;  %v2201_v4 = vld [vmem:[%s412_s26] sm:$0xff]   ;;  %vm2336_vm1 = vmmov 0   ;;  %vm475_vm2 = vcmask 261120   ;;  %s2732_s20 = scalar_lea.vmem %s2722_s2, %s2444_s19  ;;  %vm520_vm3 = vcmask 785408  }
  0x2e   : > { %2007 = vmatprep.subr.bf16.mxu0 %v2335_v3  ;;  %2015 = vmatprep.subr.bf16.mxu1 %v2335_v3  ;;  %v1921_v8 = vld [vmem:[%s2732_s20] ss:$0 sm:$0xff]  ;;  %s2337_s23 = smov 96   ;;  %vm530_vm4 = vcmask 64512   ;;  %s2338_s26 = smov 64   ;;  %vm655_vm5 = vcmask 1043456  }
  0x2f   : > { %2008 = vmatpush3.bf16.msra.mxu0 %v2200_v2  ;;  %2011 = vmatprep.mubr.msk.bf16.mxu0 %vm2336_vm1, %v2335_v3  ;;  %s2339_s13 = smov 88   ;;  %s2340_s14 = smov 120   ;;  %vm983_vm6 = vcmask 130112   ;;  %vm1220_vm7 = vcmask 195712   ;;  %vm1457_vm8 = vcmask 261312   ;;  %vm1676_vm9 = vcmask 523264  }
  0x30   : > { %2009 = vmatprep.subr.bf16.mxu0 %v2335_v3  ;;  %2017 = vmatprep.mubr.msk.bf16.mxu1 %vm2336_vm1, %v2335_v3  ;;  %s2341_s15 = smov 56   ;;  %s2342_s17 = smov 80  }
  0x31   : > { %s2343_s18 = smov 112   ;;  %s2344_s22 = smov 48  }
  0x32   : > { %s2345_s25 = smov 72   ;;  %s2346_s10 = smov 104  }
  0x33   : > { %v2485_v5 = vld [vmem:[#allocation7] sm:$0xff]  ;;  %v2487_v6 = vld [vmem:[#allocation7 + $0x8] sm:$0xff]  ;;  %2010 = vmatpush3.bf16.msra.mxu0 %v2201_v4  ;;  %s2347_s27 = smov 40   ;;  %s2348_s30 = smov 8  }
  0x34   : > { %v451_v7 = vpack.c.bf16 %v2487_v6, %v2485_v5  ;;  %2021 = vmatprep.subr.bf16.mxu0 %v2335_v3  ;;  %s2349_s20 = smov 16   ;;  %s2351_s19 = smov [#allocation7]  }
  0x36   : > { %2012 = vmatmul.mubr.msk.bf16.vlgmr.msra.gmra.mxu0 %vm475_vm2, %v451_v7 }
  0x37   : > { %2023 = vmatprep.mubr.msk.bf16.mxu0 %vm2336_vm1, %v2335_v3 }
  0xf6   : > { %v513_v9 = vpop.f32.mrf.mxu0 }
  0xf7   : > { %v514_v10 = vadd.f32 %v1921_v8, %v513_v9 }
  0xf8   : > { %v2013_v11 = vpop.f32.mrf.mxu0 }
  0xf9   : > { %521 = vst.msk [vmem:[#allocation2] sm:$0xff] %vm520_vm3, %v514_v10 }
  0xfa   : > { %v516_v12 = vpop.f32.mrf.mxu0 }
  0xfb   : > { %v517_v13 = vadd.f32 %v1921_v8, %v516_v12 }
  0xfc   : > { %v2014_v14 = vpop.f32.mrf.mxu0 }
  0xfd   : > { %522 = vst.msk [vmem:[#allocation2 + $0x8] sm:$0xff] %vm520_vm3, %v517_v13 }
 0x100   : > { %v523_v15 = vld [vmem:[#allocation2] sm:$0xff] }
 0x101   : > { %v2503_v16 = vpack.c.bf16 %v523_v15, %v523_v15 }
 0x103   : > { %528 = vrot.lane.b32.xlu0 %v2503_v16, %s2337_s23 }
 0x104   : > { %v524_v17 = vld [vmem:[#allocation2 + $0x8] sm:$0xff] }
 0x105   : > { %v2506_v18 = vpack.c.bf16 %v524_v17, %v524_v17 }
 0x107   : > { %578 = vrot.lane.b32.xlu0 %v2506_v18, %s2337_s23  ;;  %s2350_s23 = smov 24  }
 0x175   : > { %v529_v19 = vpop.permute.xlu0 %528 }
 0x176   : > { %v535_v20 = vsel %vm530_vm4, %v529_v19, 0 }
 0x177   : > { %2016 = vmatpush3.bf16.xpose.msra.mxu1 %v535_v20 }
 0x178   : > { %2027 = vmatprep.subr.bf16.mxu1 %v2335_v3 }
 0x179   : > { %v579_v21 = vpop.permute.xlu0 %578 }
 0x17a   : > { %v584_v22 = vsel %vm530_vm4, %v579_v21, 0 }
 0x17b   : > { %2022 = vmatpush3.bf16.xpose.msra.mxu0 %v584_v22 }
 0x17c   : > { %2033 = vmatprep.subr.bf16.mxu0 %v2335_v3 }
 0x17e   : > { %2018 = vmatmul.mubr.msk.bf16.vlgmr.msra.gmra.mxu1 %vm530_vm4, %v2503_v16 }
 0x17f   : > { %2029 = vmatprep.mubr.msk.bf16.mxu1 %vm2336_vm1, %v2335_v3 }
 0x182   : > { %2024 = vmatmul.mubr.msk.bf16.vlgmr.msra.gmra.mxu0 %vm530_vm4, %v2506_v18 }
 0x183   : > { %2035 = vmatprep.mubr.msk.bf16.mxu0 %vm2336_vm1, %v2335_v3 }
 0x23e   : > { %v571_v23 = vpop.f32.mrf.mxu1 }
 0x23f   : > { %v626_v24 = vsel %vm530_vm4, %v571_v23, -inf }
 0x240   : > { %627 = vmax.xlane.f32.xlu1 %v626_v24  ;;  %v2019_v25 = vpop.f32.mrf.mxu1 }
 0x242   : > { %v574_v26 = vpop.f32.mrf.mxu1  ;;  %v620_v27 = vpop.f32.mrf.mxu0 }
 0x243   : > { %v629_v28 = vsel %vm530_vm4, %v620_v27, -inf }
 0x244   : > { %v2020_v29 = vpop.f32.mrf.mxu1  ;;  %630 = vmax.xlane.f32.xlu1 %v629_v28  ;;  %v2025_v30 = vpop.f32.mrf.mxu0 }
 0x246   : > { %v623_v31 = vpop.f32.mrf.mxu0 }
 0x248   : > { %v2026_v32 = vpop.f32.mrf.mxu0 }
 0x255   : > { %650 = vrot.lane.b32.xlu1 %v2503_v16, %s2338_s26 }
 0x259   : > { %699 = vrot.lane.b32.xlu1 %v2506_v18, %s2338_s26 }
 0x25d   : > { %756 = vrot.lane.b32.xlu1 %v2503_v16, %s2339_s13 }
 0x2c9   : > { %v628_v33 = vpop.xlane.xlu1 %627 }
 0x2ca   : > { %v632_v34 = vsub.f32 %v571_v23, %v628_v33 }
 0x2cc   : > { %v634_v35 = vmul.f32 1.442695, %v632_v34 }
 0x2cd   : > { %v631_v36 = vpop.xlane.xlu1 %630 }
 0x2ce   : > { %2210 = vpow2.f32 %v634_v35  ;;  %v633_v37 = vsub.f32 %v620_v27, %v631_v36 }
 0x2d0   : > { %v636_v38 = vmul.f32 1.442695, %v633_v37 }
 0x2d1   : > { %v651_v39 = vpop.permute.xlu1 %650 }
 0x2d2   : > { %2212 = vpow2.f32 %v636_v38  ;;  %v657_v40 = vsel %vm655_vm5, %v651_v39, 0 }
 0x2d3   : > { %2028 = vmatpush3.bf16.msra.mxu1 %v657_v40 }
 0x2d4   : > { %2039 = vmatprep.subr.bf16.mxu1 %v2335_v3 }
 0x2d5   : > { %v700_v41 = vpop.permute.xlu1 %699 }
 0x2d6   : > { %v705_v42 = vsel %vm655_vm5, %v700_v41, 0 }
 0x2d7   : > { %2034 = vmatpush3.bf16.msra.mxu0 %v705_v42 }
 0x2d8   : > { %2045 = vmatprep.subr.bf16.mxu0 %v2335_v3 }
 0x2d9   : > { %v757_v47 = vpop.permute.xlu1 %756 }
 0x2da   : > { %v762_v54 = vsel %vm530_vm4, %v757_v47, 0 }
 0x2db   : > { %v2211_v43 = vpop.eup %2210 }
 0x2dc   : > { %v638_v44 = vsel %vm530_vm4, %v2211_v43, 0.0 }
 0x2dd   : > { %639 = vadd.xlane.f32.xlu0 %v638_v44 }
 0x2df   : > { %v2213_v45 = vpop.eup %2212 }
 0x2e0   : > { %v641_v46 = vsel %vm530_vm4, %v2213_v45, 0.0 }
 0x2e1   : > { %642 = vadd.xlane.f32.xlu1 %v641_v46 }
 0x2f2   : > { %807 = vrot.lane.b32.xlu1 %v2506_v18, %s2339_s13 }
 0x2f3   : > { %754 = vrot.lane.b32.xlu0 %v2503_v16, %s2340_s14 }
 0x2f6   : > { %805 = vrot.lane.b32.xlu1 %v2506_v18, %s2340_s14 }
 0x366   : > { %v640_v48 = vpop.xlane.xlu0 %639 }
 0x367   : > { %2214 = vrcp.f32 %v640_v48 }
 0x36a   : > { %v643_v49 = vpop.xlane.xlu1 %642  ;;  %v755_v59 = vpop.permute.xlu0 %754 }
 0x36b   : > { %2216 = vrcp.f32 %v643_v49 }
 0x36e   : > { %v808_v56 = vpop.permute.xlu1 %807 }
 0x36f   : > { %v813_v58 = vsel %vm530_vm4, %v808_v56, 0 }
 0x372   : > { %v806_v60 = vpop.permute.xlu1 %805 }
 0x374   : > { %v2215_v50 = vpop.eup %2214 }
 0x375   : > { %v646_v51 = vmul.f32 %v2215_v50, %v2211_v43 }
 0x377   : > { %v648_v52 = vpack.c.bf16 %v646_v51, %v646_v51 }
 0x378   : > { %v2217_v53 = vpop.eup %2216 }
 0x379   : > { %2030 = vmatmul.mubr.msk.bf16.vlgmr.msra.gmra.mxu1 %vm530_vm4, %v648_v52  ;;  %v647_v55 = vmul.f32 %v2217_v53, %v2213_v45 }
 0x37a   : > { %2040 = vmatpush3.bf16.xpose.msra.mxu1 %v762_v54  ;;  %2041 = vmatprep.mubr.msk.bf16.mxu1 %vm2336_vm1, %v2335_v3 }
 0x37b   : > { %v649_v57 = vpack.c.bf16 %v647_v55, %v647_v55  ;;  %2051 = vmatprep.subr.bf16.mxu1 %v2335_v3 }
 0x37d   : > { %2036 = vmatmul.mubr.msk.bf16.vlgmr.msra.gmra.mxu0 %vm530_vm4, %v649_v57 }
 0x37e   : > { %2046 = vmatpush3.bf16.xpose.msra.mxu0 %v813_v58  ;;  %2047 = vmatprep.mubr.msk.bf16.mxu0 %vm2336_vm1, %v2335_v3 }
 0x37f   : > { %2057 = vmatprep.subr.bf16.mxu0 %v2335_v3 }
 0x381   : > { %2042 = vmatmul.mubr.msk.bf16.vlgmr.msra.gmra.mxu1 %vm530_vm4, %v755_v59 }
 0x382   : > { %2053 = vmatprep.mubr.msk.bf16.mxu1 %vm2336_vm1, %v2335_v3 }
 0x385   : > { %2048 = vmatmul.mubr.msk.bf16.vlgmr.msra.gmra.mxu0 %vm530_vm4, %v806_v60 }
 0x386   : > { %2059 = vmatprep.mubr.msk.bf16.mxu0 %vm2336_vm1, %v2335_v3 }
 0x439   : > { %v693_v61 = vpop.f32.mrf.mxu1 }
 0x43a   : > { %747 = vst.msk [vmem:[#allocation3] sm:$0xff] %vm530_vm4, %v693_v61 }
 0x43b   : > { %v2031_v62 = vpop.f32.mrf.mxu1 }
 0x43d   : > { %v696_v63 = vpop.f32.mrf.mxu1  ;;  %v741_v0 = vpop.f32.mrf.mxu0 }
 0x43e   : > { %748 = vst.msk [vmem:[#allocation3 + $0x8] sm:$0xff] %vm530_vm4, %v741_v0 }
 0x43f   : > { %v2032_v1 = vpop.f32.mrf.mxu1  ;;  %v2037_v2 = vpop.f32.mrf.mxu0 }
 0x441   : > { %v744_v4 = vpop.f32.mrf.mxu0  ;;  %v798_v7 = vpop.f32.mrf.mxu1 }
 0x442   : > { %v855_v8 = vsel %vm530_vm4, %v798_v7, -inf }
 0x443   : > { %856 = vmax.xlane.f32.xlu1 %v855_v8  ;;  %v2038_v9 = vpop.f32.mrf.mxu0  ;;  %v2043_v10 = vpop.f32.mrf.mxu1 }
 0x445   : > { %v801_v11 = vpop.f32.mrf.mxu1  ;;  %v849_v12 = vpop.f32.mrf.mxu0 }
 0x446   : > { %v858_v13 = vsel %vm530_vm4, %v849_v12, -inf }
 0x447   : > { %v2044_v14 = vpop.f32.mrf.mxu1  ;;  %859 = vmax.xlane.f32.xlu0 %v858_v13  ;;  %v2049_v15 = vpop.f32.mrf.mxu0 }
 0x449   : > { %v852_v17 = vpop.f32.mrf.mxu0 }
 0x44b   : > { %v2050_v19 = vpop.f32.mrf.mxu0 }
 0x454   : > { %879 = vrot.lane.b32.xlu1 %v2503_v16, %s2341_s15 }
 0x458   : > { %993 = vrot.lane.b32.xlu1 %v2503_v16, %s2342_s17 }
 0x45d   : > { %927 = vrot.lane.b32.xlu0 %v2506_v18, %s2341_s15 }
 0x461   : > { %991 = vrot.lane.b32.xlu0 %v2503_v16, %s2343_s18 }
 0x4cc   : > { %v857_v20 = vpop.xlane.xlu1 %856 }
 0x4cd   : > { %v861_v21 = vsub.f32 %v798_v7, %v857_v20 }
 0x4cf   : > { %v863_v22 = vmul.f32 1.442695, %v861_v21 }
 0x4d0   : > { %v880_v23 = vpop.permute.xlu1 %879  ;;  %v860_v24 = vpop.xlane.xlu0 %859 }
 0x4d1   : > { %2218 = vpow2.f32 %v863_v22  ;;  %v885_v25 = vsel %vm655_vm5, %v880_v23, 0  ;;  %v862_v26 = vsub.f32 %v849_v12, %v860_v24 }
 0x4d2   : > { %2052 = vmatpush3.bf16.msra.mxu1 %v885_v25 }
 0x4d3   : > { %v865_v27 = vmul.f32 1.442695, %v862_v26  ;;  %2063 = vmatprep.subr.bf16.mxu1 %v2335_v3 }
 0x4d4   : > { %v928_v28 = vpop.permute.xlu0 %927  ;;  %v994_v34 = vpop.permute.xlu1 %993 }
 0x4d5   : > { %2220 = vpow2.f32 %v865_v27  ;;  %v933_v29 = vsel %vm655_vm5, %v928_v28, 0  ;;  %v999_v41 = vsel %vm530_vm4, %v994_v34, 0 }
 0x4d6   : > { %2058 = vmatpush3.bf16.msra.mxu0 %v933_v29 }
 0x4d7   : > { %2069 = vmatprep.subr.bf16.mxu0 %v2335_v3 }
 0x4d8   : > { %v992_v46 = vpop.permute.xlu0 %991 }
 0x4de   : > { %v2219_v30 = vpop.eup %2218 }
 0x4df   : > { %v867_v31 = vsel %vm530_vm4, %v2219_v30, 0.0 }
 0x4e0   : > { %868 = vadd.xlane.f32.xlu1 %v867_v31 }
 0x4e2   : > { %v2221_v32 = vpop.eup %2220 }
 0x4e3   : > { %v870_v33 = vsel %vm530_vm4, %v2221_v32, 0.0 }
 0x4e4   : > { %871 = vadd.xlane.f32.xlu1 %v870_v33 }
 0x4f5   : > { %1044 = vrot.lane.b32.xlu1 %v2506_v18, %s2342_s17 }
 0x4f9   : > { %1042 = vrot.lane.b32.xlu1 %v2506_v18, %s2343_s18 }
 0x569   : > { %v869_v35 = vpop.xlane.xlu1 %868 }
 0x56a   : > { %2222 = vrcp.f32 %v869_v35 }
 0x56d   : > { %v872_v36 = vpop.xlane.xlu1 %871 }
 0x56e   : > { %2224 = vrcp.f32 %v872_v36 }
 0x571   : > { %v1045_v43 = vpop.permute.xlu1 %1044 }
 0x572   : > { %v1050_v45 = vsel %vm530_vm4, %v1045_v43, 0 }
 0x575   : > { %v1043_v47 = vpop.permute.xlu1 %1042 }
 0x577   : > { %v2223_v37 = vpop.eup %2222 }
 0x578   : > { %v875_v38 = vmul.f32 %v2223_v37, %v2219_v30 }
 0x57a   : > { %v877_v39 = vpack.c.bf16 %v875_v38, %v875_v38 }
 0x57b   : > { %v2225_v40 = vpop.eup %2224 }
 0x57c   : > { %2054 = vmatmul.mubr.msk.bf16.vlgmr.msra.gmra.mxu1 %vm530_vm4, %v877_v39  ;;  %v876_v42 = vmul.f32 %v2225_v40, %v2221_v32 }
 0x57d   : > { %2064 = vmatpush3.bf16.xpose.msra.mxu1 %v999_v41  ;;  %2065 = vmatprep.mubr.msk.bf16.mxu1 %vm2336_vm1, %v2335_v3 }
 0x57e   : > { %v878_v44 = vpack.c.bf16 %v876_v42, %v876_v42  ;;  %2075 = vmatprep.subr.bf16.mxu1 %v2335_v3 }
 0x580   : > { %2060 = vmatmul.mubr.msk.bf16.vlgmr.msra.gmra.mxu0 %vm530_vm4, %v878_v44 }
 0x581   : > { %2070 = vmatpush3.bf16.xpose.msra.mxu0 %v1050_v45  ;;  %2071 = vmatprep.mubr.msk.bf16.mxu0 %vm2336_vm1, %v2335_v3 }
 0x582   : > { %2081 = vmatprep.subr.bf16.mxu0 %v2335_v3 }
 0x584   : > { %2066 = vmatmul.mubr.msk.bf16.vlgmr.msra.gmra.mxu1 %vm530_vm4, %v992_v46 }
 0x585   : > { %2077 = vmatprep.mubr.msk.bf16.mxu1 %vm2336_vm1, %v2335_v3 }
 0x588   : > { %2072 = vmatmul.mubr.msk.bf16.vlgmr.msra.gmra.mxu0 %vm530_vm4, %v1043_v47 }
 0x589   : > { %2083 = vmatprep.mubr.msk.bf16.mxu0 %vm2336_vm1, %v2335_v3 }
 0x63c   : > { %v2583_v48 = vpop.f32.mrf.mxu1 }
 0x63e   : > { %v2055_v49 = vpop.f32.mrf.mxu1 }
 0x640   : > { %v924_v50 = vpop.f32.mrf.mxu1  ;;  %v2585_v51 = vpop.f32.mrf.mxu0 }
 0x642   : > { %v2056_v52 = vpop.f32.mrf.mxu1  ;;  %v2061_v53 = vpop.f32.mrf.mxu0 }
 0x644   : > { %v972_v54 = vpop.f32.mrf.mxu0  ;;  %v1035_v55 = vpop.f32.mrf.mxu1 }
 0x645   : > { %v1092_v56 = vsel %vm530_vm4, %v1035_v55, -inf }
 0x646   : > { %1093 = vmax.xlane.f32.xlu0 %v1092_v56  ;;  %v2062_v57 = vpop.f32.mrf.mxu0  ;;  %v2067_v58 = vpop.f32.mrf.mxu1 }
 0x648   : > { %v1038_v59 = vpop.f32.mrf.mxu1  ;;  %v1086_v60 = vpop.f32.mrf.mxu0 }
 0x649   : > { %v1095_v61 = vsel %vm530_vm4, %v1086_v60, -inf }
 0x64a   : > { %v2068_v62 = vpop.f32.mrf.mxu1  ;;  %1096 = vmax.xlane.f32.xlu1 %v1095_v61  ;;  %v2073_v63 = vpop.f32.mrf.mxu0 }
 0x64c   : > { %v1089_v0 = vpop.f32.mrf.mxu0 }
 0x64e   : > { %v2074_v1 = vpop.f32.mrf.mxu0 }
 0x65b   : > { %1116 = vrot.lane.b32.xlu1 %v2503_v16, %s2344_s22 }
 0x65f   : > { %1230 = vrot.lane.b32.xlu1 %v2503_v16, %s2345_s25 }
 0x663   : > { %1281 = vrot.lane.b32.xlu1 %v2506_v18, %s2345_s25 }
 0x667   : > { %1279 = vrot.lane.b32.xlu1 %v2506_v18, %s2346_s10 }
 0x6cf   : > { %v1094_v2 = vpop.xlane.xlu0 %1093 }
 0x6d0   : > { %v1098_v4 = vsub.f32 %v1035_v55, %v1094_v2 }
 0x6d2   : > { %v1100_v7 = vmul.f32 1.442695, %v1098_v4 }
 0x6d3   : > { %v1097_v8 = vpop.xlane.xlu1 %1096 }
 0x6d4   : > { %2226 = vpow2.f32 %v1100_v7  ;;  %v1099_v9 = vsub.f32 %v1086_v60, %v1097_v8 }
 0x6d6   : > { %v1102_v10 = vmul.f32 1.442695, %v1099_v9 }
 0x6d7   : > { %v1117_v11 = vpop.permute.xlu1 %1116 }
 0x6d8   : > { %2228 = vpow2.f32 %v1102_v10  ;;  %v1122_v12 = vsel %vm655_vm5, %v1117_v11, 0 }
 0x6d9   : > { %2076 = vmatpush3.bf16.msra.mxu1 %v1122_v12 }
 0x6da   : > { %2087 = vmatprep.subr.bf16.mxu1 %v2335_v3 }
 0x6db   : > { %v1231_v24 = vpop.permute.xlu1 %1230 }
 0x6dc   : > { %v1236_v28 = vsel %vm530_vm4, %v1231_v24, 0 }
 0x6df   : > { %v1282_v30 = vpop.permute.xlu1 %1281 }
 0x6e0   : > { %v1287_v32 = vsel %vm530_vm4, %v1282_v30, 0 }
 0x6e1   : > { %v2227_v13 = vpop.eup %2226 }
 0x6e2   : > { %v1104_v14 = vsel %vm530_vm4, %v2227_v13, 0.0 }
 0x6e3   : > { %1105 = vadd.xlane.f32.xlu0 %v1104_v14  ;;  %v1280_v34 = vpop.permute.xlu1 %1279 }
 0x6e5   : > { %v2229_v15 = vpop.eup %2228 }
 0x6e6   : > { %v1107_v17 = vsel %vm530_vm4, %v2229_v15, 0.0 }
 0x6e7   : > { %1108 = vadd.xlane.f32.xlu0 %v1107_v17  ;;  %v2202_v17 = vld [vmem:[%s2457_s12 + $0x8] sm:$0xff]  }
 0x6fd   : > { %1164 = vrot.lane.b32.xlu0 %v2506_v18, %s2344_s22 }
 0x701   : > { %1228 = vrot.lane.b32.xlu0 %v2503_v16, %s2346_s10 }
 0x76c   : > { %v1106_v19 = vpop.xlane.xlu0 %1105 }
 0x76d   : > { %2230 = vrcp.f32 %v1106_v19  ;;  %v2203_v19 = vld [vmem:[%s2457_s12] sm:$0xff]  }
 0x770   : > { %v1109_v20 = vpop.xlane.xlu0 %1108 }
 0x771   : > { %2232 = vrcp.f32 %v1109_v20 }
 0x774   : > { %v1165_v21 = vpop.permute.xlu0 %1164 }
 0x775   : > { %v1170_v22 = vsel %vm655_vm5, %v1165_v21, 0 }
 0x776   : > { %2082 = vmatpush3.bf16.msra.mxu0 %v1170_v22 }
 0x777   : > { %2093 = vmatprep.subr.bf16.mxu0 %v2335_v3 }
 0x778   : > { %v1229_v33 = vpop.permute.xlu0 %1228 }
 0x77a   : > { %v2231_v23 = vpop.eup %2230 }
 0x77b   : > { %v1112_v25 = vmul.f32 %v2231_v23, %v2227_v13 }
 0x77d   : > { %v1114_v26 = vpack.c.bf16 %v1112_v25, %v1112_v25 }
 0x77e   : > { %v2233_v27 = vpop.eup %2232 }
 0x77f   : > { %2078 = vmatmul.mubr.msk.bf16.vlgmr.msra.gmra.mxu1 %vm530_vm4, %v1114_v26  ;;  %v1113_v29 = vmul.f32 %v2233_v27, %v2229_v15 }
 0x780   : > { %2088 = vmatpush3.bf16.xpose.msra.mxu1 %v1236_v28  ;;  %2089 = vmatprep.mubr.msk.bf16.mxu1 %vm2336_vm1, %v2335_v3 }
 0x781   : > { %v1115_v31 = vpack.c.bf16 %v1113_v29, %v1113_v29  ;;  %2099 = vmatprep.subr.bf16.mxu1 %v2335_v3 }
 0x783   : > { %2084 = vmatmul.mubr.msk.bf16.vlgmr.msra.gmra.mxu0 %vm530_vm4, %v1115_v31 }
 0x784   : > { %2094 = vmatpush3.bf16.xpose.msra.mxu0 %v1287_v32  ;;  %2095 = vmatprep.mubr.msk.bf16.mxu0 %vm2336_vm1, %v2335_v3 }
 0x785   : > { %2105 = vmatprep.subr.bf16.mxu0 %v2335_v3 }
 0x787   : > { %2090 = vmatmul.mubr.msk.bf16.vlgmr.msra.gmra.mxu1 %vm530_vm4, %v1229_v33  ;;  %v1468_v33 = vlaneseq }
 0x788   : > { %2101 = vmatprep.mubr.msk.bf16.mxu1 %vm2336_vm1, %v2335_v3 }
 0x78b   : > { %2096 = vmatmul.mubr.msk.bf16.vlgmr.msra.gmra.mxu0 %vm530_vm4, %v1280_v34  ;;  %v2648_v34 = vshrl.u32 %v1468_v33, 7 }
 0x78c   : > { %2107 = vmatprep.mubr.msk.bf16.mxu0 %vm2336_vm1, %v2335_v3 }
 0x83f   : > { %v1158_v35 = vpop.f32.mrf.mxu1 }
 0x841   : > { %v2079_v36 = vpop.f32.mrf.mxu1 }
 0x842   : > { %v2652_v36 = vld [vmem:[%s2468_s21] sm:$0x3f]  ;;  %s1772_s21 = sshll.u32 %s2351_s19, 4  ;;  %s1773_s21 = int_to_ptr.vmem [resolvable:$true] %s1772_s21 }
 0x843   : > { %v1161_v37 = vpop.f32.mrf.mxu1  ;;  %v1206_v38 = vpop.f32.mrf.mxu0  ;;  %s2276_s26 = scalar_lea.vmem %s1773_s21, 256  ;;  %p2283_p7 = scmp.lt.s32.totalorder %s1773_s21, %s1773_s21 }
 0x844   : > { %p2277_p4 = scmp.ne.s32.totalorder %s1773_s21, %s2276_s26  ;;  %p2284_p8 = scmp.lt.s32.totalorder %s2276_s26, %s2276_s26 }
 0x845   : > { %v2080_v39 = vpop.f32.mrf.mxu1  ;;  %v2085_v40 = vpop.f32.mrf.mxu0 }
 0x846   : > { %p2285_p9 = por %p2284_p8, %p2283_p7 }
 0x847   : > { %v1209_v41 = vpop.f32.mrf.mxu0  ;;  %v1272_v42 = vpop.f32.mrf.mxu1 }
 0x848   : > { %v1329_v43 = vsel %vm530_vm4, %v1272_v42, -inf }
 0x849   : > { %1330 = vmax.xlane.f32.xlu0 %v1329_v43  ;;  %v2086_v44 = vpop.f32.mrf.mxu0  ;;  %v2091_v45 = vpop.f32.mrf.mxu1 }
 0x84b   : > { %v1275_v46 = vpop.f32.mrf.mxu1  ;;  %v1323_v47 = vpop.f32.mrf.mxu0 }
 0x84c   : > { %v1332_v49 = vsel %vm530_vm4, %v1323_v47, -inf }
 0x84d   : > { %v2092_v50 = vpop.f32.mrf.mxu1  ;;  %1333 = vmax.xlane.f32.xlu1 %v1332_v49  ;;  %v2097_v52 = vpop.f32.mrf.mxu0 }
 0x84f   : > { %v1326_v53 = vpop.f32.mrf.mxu0 }
 0x851   : > { %v2098_v54 = vpop.f32.mrf.mxu0 }
 0x85e   : > { %1353 = vrot.lane.b32.xlu1 %v2503_v16, %s2347_s27 }
 0x862   : > { %977 = vrot.lane.b32.xlu1 %v2583_v48, %s2348_s30 }
 0x866   : > { %979 = vrot.lane.b32.xlu1 %v2585_v51, %s2348_s30 }
 0x86a   : > { %1216 = vrot.lane.b32.xlu1 %v1206_v38, %s2349_s20 }
 0x8d2   : > { %v1331_v55 = vpop.xlane.xlu0 %1330 }
 0x8d3   : > { %v1335_v56 = vsub.f32 %v1272_v42, %v1331_v55 }
 0x8d5   : > { %v1337_v57 = vmul.f32 1.442695, %v1335_v56 }
 0x8d6   : > { %v1334_v58 = vpop.xlane.xlu1 %1333 }
 0x8d7   : > { %2234 = vpow2.f32 %v1337_v57  ;;  %v1336_v59 = vsub.f32 %v1323_v47, %v1334_v58 }
 0x8d9   : > { %v1339_v60 = vmul.f32 1.442695, %v1336_v59  ;;  %v2205_v59 = vld [vmem:[%s2463_s16] sm:$0xff]  }
 0x8da   : > { %v1354_v61 = vpop.permute.xlu1 %1353 }
 0x8db   : > { %2236 = vpow2.f32 %v1339_v60  ;;  %v1359_v16 = vsel %vm655_vm5, %v1354_v61, 0  ;;  %v2206_v60 = vld [vmem:[%s2478_s11 + $0x18] sm:$0xff]  }
 0x8dc   : > { %2100 = vmatpush3.bf16.msra.mxu1 %v1359_v16 }
 0x8dd   : > { %2111 = vmatprep.subr.bf16.mxu1 %v2335_v3 }
 0x8de   : > { %v978_v48 = vpop.permute.xlu1 %977 }
 0x8df   : > { %984 = vst.msk [vmem:[#allocation3] sm:$0xff] %vm983_vm6, %v978_v48 }
 0x8e2   : > { %v980_v51 = vpop.permute.xlu1 %979 }
 0x8e3   : > { %985 = vst.msk [vmem:[#allocation3 + $0x8] sm:$0xff] %vm983_vm6, %v980_v51 }
 0x8e4   : > { %v2235_v62 = vpop.eup %2234 }
 0x8e5   : > { %v1341_v63 = vsel %vm530_vm4, %v2235_v62, 0.0 }
 0x8e6   : > { %1342 = vadd.xlane.f32.xlu0 %v1341_v63  ;;  %v1217_v0 = vpop.permute.xlu1 %1216 }
 0x8e7   : > { %1222 = vst.msk [vmem:[#allocation3 + $0x8] sm:$0xff] %vm1220_vm7, %v1217_v0  ;;  %v1557_v0 = vsub.s32 1, %v2648_v34 }
 0x8e8   : > { %v2237_v1 = vpop.eup %2236 }
 0x8e9   : > { %v1344_v2 = vsel %vm530_vm4, %v2237_v1, 0.0 }
 0x8ea   : > { %1345 = vadd.xlane.f32.xlu0 %v1344_v2 }
 0x900   : > { %1401 = vrot.lane.b32.xlu0 %v2506_v18, %s2347_s27 }
 0x904   : > { %1214 = vrot.lane.b32.xlu0 %v1158_v35, %s2349_s20  ;;  %v1470_v35 = vsub.s32 0, %v2648_v34 }
 0x906   : > { %v1471_v37 = vrot.slane %v2652_v36, %v1470_v35 }
 0x96f   : > { %v1343_v4 = vpop.xlane.xlu0 %1342 }
 0x970   : > { %2238 = vrcp.f32 %v1343_v4 }
 0x973   : > { %v1346_v7 = vpop.xlane.xlu0 %1345 }
 0x974   : > { %2240 = vrcp.f32 %v1346_v7  ;;  %v1565_v7 = vsub.s32 2, %v2648_v34 }
 0x977   : > { %v1402_v8 = vpop.permute.xlu0 %1401 }
 0x978   : > { %v1407_v9 = vsel %vm655_vm5, %v1402_v8, 0 }
 0x979   : > { %2106 = vmatpush3.bf16.msra.mxu0 %v1407_v9 }
 0x97a   : > { %2119 = vmatprep.subr.bf16.mxu0 %v2335_v3 }
 0x97b   : > { %v1215_v10 = vpop.permute.xlu0 %1214 }
 0x97c   : > { %1221 = vst.msk [vmem:[#allocation3] sm:$0xff] %vm1220_vm7, %v1215_v10 }
 0x97d   : > { %v2239_v11 = vpop.eup %2238 }
 0x97e   : > { %v1349_v12 = vmul.f32 %v2239_v11, %v2235_v62  ;;  %v1566_v11 = vrot.slane %v2652_v36, %v1565_v7 }
 0x980   : > { %v1351_v13 = vpack.c.bf16 %v1349_v12, %v1349_v12 }
 0x981   : > { %v2241_v18 = vpop.eup %2240 }
 0x982   : > { %2102 = vmatmul.mubr.msk.bf16.vlgmr.msra.gmra.mxu1 %vm530_vm4, %v1351_v13  ;;  %v1350_v14 = vmul.f32 %v2241_v18, %v2237_v1  ;;  %v1558_v1 = vrot.slane %v2652_v36, %v1557_v0 }
 0x983   : > { %2115 = vmatprep.mubr.msk.bf16.mxu1 %vm2336_vm1, %v2335_v3  ;;  %2112 = vmatpush3.bf16.msra.mxu1 %v2202_v17  ;;  %v2208_v17 = vld [vmem:[%s2478_s11 + $0x8] sm:$0xff]  }
 0x984   : > { %v1352_v15 = vpack.c.bf16 %v1350_v14, %v1350_v14  ;;  %2113 = vmatprep.subr.bf16.mxu1 %v2335_v3 }
 0x986   : > { %2108 = vmatmul.mubr.msk.bf16.vlgmr.msra.gmra.mxu0 %vm530_vm4, %v1352_v15  ;;  %v2207_v15 = vld [vmem:[%s2478_s11 + $0x10] sm:$0xff]  }
 0x987   : > { %2123 = vmatprep.mubr.msk.bf16.mxu0 %vm2336_vm1, %v2335_v3  ;;  %2114 = vmatpush3.bf16.msra.mxu1 %v2203_v19  ;;  %v2209_v19 = vld [vmem:[%s2478_s11] sm:$0xff]  }
 0x988   : > { %2127 = vmatprep.subr.bf16.mxu1 %v2335_v3 }
 0xa42   : > { %v1395_v20 = vpop.f32.mrf.mxu1 }
 0xa43   : > { %1451 = vrot.lane.b32.xlu0 %v1395_v20, %s2350_s23  ;;  %v1944_v20 = vld [vmem:[%s432_s24] ss:$0 sm:$0xff]  ;;  %s2733_s24 = sadd.s32 4294967295, %s2330_s29  }
 0xa44   : > { %v2103_v21 = vpop.f32.mrf.mxu1  ;;  %p2694_p3 = scmp.eq.s32.totalorder %s2733_s24, 1 }
 0xa46   : > { %v1398_v22 = vpop.f32.mrf.mxu1  ;;  %v1443_v23 = vpop.f32.mrf.mxu0  ;;  %p2278_p5 = pnand %p2277_p4, %p2694_p3 }
 0xa47   : > { %1453 = vrot.lane.b32.xlu1 %v1443_v23, %s2350_s23 }
 0xa48   : > { %v2104_v24 = vpop.f32.mrf.mxu1  ;;  %v2109_v25 = vpop.f32.mrf.mxu0  ;;  %p2279_p6 = pneg %p2278_p5 }
 0xa4a   : > { %v1446_v26 = vpop.f32.mrf.mxu0  ;;  %p2286_p10 = pnand %p2285_p9, %p2279_p6 }
 0xa4c   : > { %v2110_v27 = vpop.f32.mrf.mxu0 }
 0xab5   : > { %v1452_v28 = vpop.permute.xlu0 %1451 }
 0xab6   : > { %1458 = vst.msk [vmem:[#allocation3] sm:$0xff] %vm1457_vm8, %v1452_v28 }
 0xab9   : > { %v1454_v29 = vpop.permute.xlu1 %1453 }
 0xaba   : > { %1459 = vst.msk [vmem:[#allocation3 + $0x8] sm:$0xff] %vm1457_vm8, %v1454_v29 }
 0xabd   : > { %v1461_v30 = vld [vmem:[#allocation3] sm:$0xff] }
 0xac1   : > { %v1462_v31 = vld [vmem:[#allocation3 + $0x8] sm:$0xff] }
 0xac2   : > { %v1463_v32 = vpack.c.bf16 %v1462_v31, %v1461_v30 }
 0xac4   : > { %2116 = vmatmul.mubr.msk.bf16.vlgmr.msra.gmra.mxu1 %vm475_vm2, %v1463_v32 }
 0xac5   : > { %2135 = vmatprep.mubr.msk.bf16.mxu1 %vm2336_vm1, %v2335_v3  ;;  %2128 = vmatpush3.bf16.msra.mxu1 %v2206_v60 }
 0xac6   : > { %2129 = vmatprep.subr.bf16.mxu1 %v2335_v3 }
 0xac9   : > { %2130 = vmatpush3.bf16.msra.mxu1 %v2207_v15 }
 0xaca   : > { %2131 = vmatprep.subr.bf16.mxu1 %v2335_v3 }
 0xacd   : > { %2132 = vmatpush3.bf16.msra.mxu1 %v2208_v17 }
 0xace   : > { %2133 = vmatprep.subr.bf16.mxu1 %v2335_v3 }
 0xad1   : > { %2134 = vmatpush3.bf16.msra.mxu1 %v2209_v19 }
 0xb84   : > { %v1521_v38 = vpop.f32.mrf.mxu1 }
 0xb85   : > { %v1522_v39 = vadd.f32 %v1521_v38, %v1471_v37 }
 0xb86   : > { %v2117_v40 = vpop.f32.mrf.mxu1 }
 0xb87   : > { %v1528_v41 = vadd.f32 %v1522_v39, %v2485_v5 }
 0xb88   : > { %v1524_v42 = vpop.f32.mrf.mxu1 }
 0xb89   : > { %v1525_v43 = vadd.f32 %v1524_v42, %v1471_v37  ;;  %v1530_v44 = vsel %vm475_vm2, %v1528_v41, 0.0 }
 0xb8a   : > { %1531 = vadd.xlane.f32.xlu0 %v1530_v44  ;;  %v2118_v45 = vpop.f32.mrf.mxu1 }
 0xb8b   : > { %v1529_v46 = vadd.f32 %v1525_v43, %v2487_v6  ;;  %v2204_v6 = vld [vmem:[%s2463_s16 + $0x8] sm:$0xff]  }
 0xb8c   : > { %2120 = vmatpush3.bf16.msra.mxu0 %v2204_v6 }
 0xb8d   : > { %v1533_v47 = vsel %vm475_vm2, %v1529_v46, 0.0  ;;  %2121 = vmatprep.subr.bf16.mxu0 %v2335_v3  ;;  %v1650_v3 = vsub.s32 3, %v2648_v34 }
 0xb8e   : > { %1534 = vadd.xlane.f32.xlu1 %v1533_v47 }
 0xb8f   : > { %v1651_v30 = vrot.slane %v2652_v36, %v1650_v3 }
 0xb90   : > { %2122 = vmatpush3.bf16.msra.mxu0 %v2205_v59  ;;  %v1749_v59 = vsub.s32 4, %v2648_v34 }
 0xb92   : > { %v1750_v60 = vrot.slane %v2652_v36, %v1749_v59 }
 0xc13   : > { %v1532_v49 = vpop.xlane.xlu0 %1531 }
 0xc14   : > { %v1537_v50 = vmul.f32 0.03125, %v1532_v49 }
 0xc16   : > { %v1539_v52 = vsub.f32 %v1528_v41, %v1537_v50 }
 0xc17   : > { %v1535_v53 = vpop.xlane.xlu1 %1534 }
 0xc18   : > { %v1538_v54 = vmul.f32 0.03125, %v1535_v53  ;;  %v1541_v5 = vmul.f32 %v1539_v52, %v1539_v52 }
 0xc1a   : > { %v1540_v55 = vsub.f32 %v1529_v46, %v1538_v54  ;;  %v1543_v56 = vsel %vm475_vm2, %v1541_v5, 0.0 }
 0xc1b   : > { %1544 = vadd.xlane.f32.xlu0 %v1543_v56 }
 0xc1c   : > { %v1542_v57 = vmul.f32 %v1540_v55, %v1540_v55 }
 0xc1e   : > { %v1546_v58 = vsel %vm475_vm2, %v1542_v57, 0.0 }
 0xc1f   : > { %1547 = vadd.xlane.f32.xlu0 %v1546_v58 }
 0xca4   : > { %v1545_v61 = vpop.xlane.xlu0 %1544 }
 0xca5   : > { %v1549_v16 = vmul.f32 0.03125, %v1545_v61  ;;  %v1757_v61 = vsub.s32 5, %v2648_v34 }
 0xca7   : > { %v1551_v48 = vadd.f32 1e-05, %v1549_v16 }
 0xca8   : > { %v1548_v51 = vpop.xlane.xlu0 %1547 }
 0xca9   : > { %2242 = vrsqrt.f32 %v1551_v48  ;;  %v1550_v62 = vmul.f32 0.03125, %v1548_v51  ;;  %v1758_v51 = vrot.slane %v2652_v36, %v1757_v61 }
 0xcab   : > { %v1552_v63 = vadd.f32 1e-05, %v1550_v62 }
 0xcad   : > { %2244 = vrsqrt.f32 %v1552_v63 }
 0xcb6   : > { %v2243_v2 = vpop.eup %2242 }
 0xcb7   : > { %v1559_v4 = vmul.f32 %v2243_v2, %v1558_v1 }
 0xcb9   : > { %v1561_v10 = vmul.f32 %v1559_v4, %v1539_v52 }
 0xcba   : > { %v2245_v8 = vpop.eup %2244 }
 0xcbb   : > { %v1560_v9 = vmul.f32 %v2245_v8, %v1558_v1  ;;  %v1567_v13 = vadd.f32 %v1566_v11, %v1561_v10 }
 0xcbd   : > { %v1562_v12 = vmul.f32 %v1560_v9, %v1540_v55 }
 0xcbf   : > { %v1568_v18 = vadd.f32 %v1566_v11, %v1562_v12 }
 0xcc1   : > { %v1569_v14 = vpack.c.bf16 %v1568_v18, %v1567_v13 }
 0xcc3   : > { %2124 = vmatmul.mubr.msk.bf16.vlgmr.msra.gmra.mxu0 %vm475_vm2, %v1569_v14 }
 0xd83   : > { %v1630_v21 = vpop.f32.mrf.mxu0 }
 0xd84   : > { %v1631_v23 = vadd.f32 %v1944_v20, %v1630_v21 }
 0xd85   : > { %v2125_v22 = vpop.f32.mrf.mxu0 }
 0xd86   : > { %v1637_v27 = vmax.f32 %v1631_v23, 0.0 }
 0xd87   : > { %v1633_v24 = vpop.f32.mrf.mxu0 }
 0xd88   : > { %v1634_v25 = vadd.f32 %v1944_v20, %v1633_v24 }
 0xd89   : > { %v2126_v26 = vpop.f32.mrf.mxu0 }
 0xd8a   : > { %v1638_v28 = vmax.f32 %v1634_v25, 0.0 }
 0xd8c   : > { %v1639_v29 = vpack.c.bf16 %v1638_v28, %v1637_v27 }
 0xd8e   : > { %2136 = vmatmul.mubr.msk.bf16.vlgmr.msra.gmra.mxu1 %vm1676_vm9, %v1639_v29 }
 0xe4e   : > { %v1714_v31 = vpop.f32.mrf.mxu1 }
 0xe4f   : > { %v1715_v32 = vadd.f32 %v1714_v31, %v1651_v30 }
 0xe50   : > { %v2137_v33 = vpop.f32.mrf.mxu1 }
 0xe51   : > { %v1721_v35 = vadd.f32 %v1715_v32, %v1567_v13 }
 0xe52   : > { %v1717_v37 = vpop.f32.mrf.mxu1 }
 0xe53   : > { %v1718_v38 = vadd.f32 %v1717_v37, %v1651_v30  ;;  %v1723_v39 = vsel %vm475_vm2, %v1721_v35, 0.0 }
 0xe54   : > { %1724 = vadd.xlane.f32.xlu1 %v1723_v39  ;;  %v2138_v40 = vpop.f32.mrf.mxu1 }
 0xe55   : > { %v1722_v41 = vadd.f32 %v1718_v38, %v1568_v18 }
 0xe57   : > { %v1726_v42 = vsel %vm475_vm2, %v1722_v41, 0.0 }
 0xe58   : > { %1727 = vadd.xlane.f32.xlu0 %v1726_v42 }
 0xedd   : > { %v1725_v43 = vpop.xlane.xlu1 %1724 }
 0xede   : > { %v1729_v44 = vmul.f32 0.03125, %v1725_v43 }
 0xee0   : > { %v1731_v45 = vsub.f32 %v1721_v35, %v1729_v44 }
 0xee1   : > { %v1728_v46 = vpop.xlane.xlu0 %1727 }
 0xee2   : > { %v1730_v47 = vmul.f32 0.03125, %v1728_v46  ;;  %v1733_v49 = vmul.f32 %v1731_v45, %v1731_v45 }
 0xee4   : > { %v1732_v50 = vsub.f32 %v1722_v41, %v1730_v47  ;;  %v1735_v52 = vsel %vm475_vm2, %v1733_v49, 0.0 }
 0xee5   : > { %1736 = vadd.xlane.f32.xlu1 %v1735_v52 }
 0xee6   : > { %v1734_v53 = vmul.f32 %v1732_v50, %v1732_v50 }
 0xee8   : > { %v1738_v54 = vsel %vm475_vm2, %v1734_v53, 0.0 }
 0xee9   : > { %1739 = vadd.xlane.f32.xlu0 %v1738_v54 }
 0xf6e   : > { %v1737_v5 = vpop.xlane.xlu1 %1736 }
 0xf6f   : > { %v1741_v55 = vmul.f32 0.03125, %v1737_v5 }
 0xf71   : > { %v1743_v56 = vadd.f32 1e-05, %v1741_v55 }
 0xf72   : > { %v1740_v57 = vpop.xlane.xlu0 %1739 }
 0xf73   : > { %2246 = vrsqrt.f32 %v1743_v56  ;;  %v1742_v58 = vmul.f32 0.03125, %v1740_v57 }
 0xf75   : > { %v1744_v6 = vadd.f32 1e-05, %v1742_v58 }
 0xf77   : > { %2248 = vrsqrt.f32 %v1744_v6 }
 0xf80   : > { %v2247_v16 = vpop.eup %2246 }
 0xf81   : > { %v1751_v48 = vmul.f32 %v2247_v16, %v1750_v60 }
 0xf83   : > { %v1753_v62 = vmul.f32 %v1751_v48, %v1731_v45 }
 0xf84   : > { %v2249_v63 = vpop.eup %2248 }
 0xf85   : > { %v1752_v0 = vmul.f32 %v2249_v63, %v1750_v60  ;;  %v1759_v1 = vadd.f32 %v1758_v51, %v1753_v62 }
 0xf87   : > { %v1754_v2 = vmul.f32 %v1752_v0, %v1732_v50  ;;  %1761 = vst.msk [vmem:[#allocation7] sm:$0xff] %vm475_vm2, %v1759_v1 }
 0xf89   : > { %v1760_v34 = vadd.f32 %v1758_v51, %v1754_v2 }
 0xf8b   : > { %1762 = vst.msk [vmem:[#allocation7 + $0x8] sm:$0xff] %vm475_vm2, %v1760_v34 }
 0xf8c   : > { %2289 = shalt.err (!%p2286_p10)
}
 0xf8d   : > { %s2352_s13 = smov 128  }
 0xf8e   : > { %2144 = dma.vmem_to_hbm [thread:$0]  (%p2694_p3), %s1773_s21, 256, %s2728_s8, [#allocation6], %s2352_s13, %s2352_s13, %s2348_s30  }
 0xf8f   : > { %2317 = dma.done.wait (%p2694_p3), [#allocation6], 256  }
 0xf90   : > { %2319 = vsyncadd (%p2694_p3), [#allocation6], 4294967040 }
 0xf91 PF: > { %s20_s29 = sadd.s32 1, %s2330_s29   ;;  %s2735_s27 = smov %s2326_s28 }
 0xf92   : > { %p17_p11 = scmp.ge.s32.totalorder %s20_s29, 4   ;;  %s2736_s28 = smov %s2738_s9 }
 0xf94   :  { %19 = sbr.rel (!%p17_p11) target bundleno = 3 (0x3), region = 108 }
 0xf99   :  { %1788 = vsyncpa [#allocation5], 1 }
 0xf9a   :  { %1790 = vsyncpa [#allocation5 + $0x1], 1 }
 0xf9b   :  { %1791 = vsyncpa [#allocation6], 1 }
 0xf9c   :  { %1793 = vsyncpa [#allocation6 + $0x1], 1 }

</bundles_post_ra>
